<compile_context>
chip_gen: v7x
topology: tpu7x:2x2x1
jax: 0.10.0
libtpu: 0.0.40
codegen_flags: <defaults>
</compile_context>

<pallas_src>
import jax
import jax.numpy as jnp
from jax import lax
from jax.experimental import pallas as pl
from jax.experimental.pallas import tpu as pltpu

_MIB = 1024 * 1024


def _pad8(n):
    return max(8, ((n + 7) // 8) * 8)


def _make_kernel(tq, p1, mxu_bf16):
    """tq: q-tile width (lanes), p1: 8-padded C//8, mxu_bf16: cast MXU operands."""
    s_lo = 0          # ws^T rows (1 real row in an 8-row padded segment)
    f_lo = 8          # wf^T rows
    g_lo = 8 + p1     # wg^T rows

    def kernel(x_ref, wt_ref, b_ref, gamma_ref, att_ref, out_ref,
               fgs_ref, acc_ref):
        # x_ref:   [1, C, HW]   channel-first block (lane dim = HW, lane-dense)
        # wt_ref:  [O_pad, C]   fused, 8-sublane-padded 1x1-conv weights
        # b_ref:   [O_pad, 1]   fused, padded biases
        # gamma:   scalar (SMEM)
        # att_ref: [1, 1, HW]   out_ref: [1, C, HW]  (lane-dense stores)
        # fgs_ref: [O_pad, HW]  fused-conv cache      acc_ref: [1, HW] f32
        qi = pl.program_id(1)
        last_q = pl.num_programs(1) - 1

        # First q step of each image: one MXU pass for all three 1x1 convs,
        # cached in VMEM scratch; zero the attention accumulator.
        @pl.when(qi == 0)
        def _():
            xb = x_ref[0]                                          # [C, HW]
            fgs = lax.dot_general(wt_ref[...], xb, (((1,), (0,)), ((), ())),
                                  preferred_element_type=jnp.float32)
            fgs_ref[...] = fgs + b_ref[...]
            acc_ref[...] = jnp.zeros_like(acc_ref)

        q0 = pl.multiple_of(qi * tq, tq)
        fT = fgs_ref[pl.ds(f_lo, p1), :]                           # [P1, HW]
        gTq = fgs_ref[pl.ds(g_lo, p1), pl.ds(q0, tq)]              # [P1, tq]
        sTq = fgs_ref[pl.ds(s_lo, 1), pl.ds(q0, tq)]               # [1,  tq]

        if mxu_bf16:
            f_op = fT.astype(jnp.bfloat16)
            g_op = gTq.astype(jnp.bfloat16)
        else:
            f_op, g_op = fT, gTq

        # logits[p, q] = sum_c fT[c, p] * gT[c, q]  (zero-padded rows are inert)
        logits = lax.dot_general(f_op, g_op, (((0,), (0,)), ((), ())),
                                 preferred_element_type=jnp.float32)  # [HW, tq]

        # softmax over p (torch dim=1) -- complete per q column, so per-q-tile
        # normalization is exact; normalization folded into s (no renormalized
        # [HW, tq] tile is materialized).
        m = jnp.max(logits, axis=0, keepdims=True)                 # [1, tq]
        e = jnp.exp(logits - m)                                    # [HW, tq] f32
        colsum = jnp.sum(e, axis=0, keepdims=True)                 # [1, tq]
        s_scaled = sTq * pl.reciprocal(colsum, approx=True)        # [1, tq]

        if mxu_bf16:
            e_op = e.astype(jnp.bfloat16)
            s_op = s_scaled.astype(jnp.bfloat16)
        else:
            e_op, s_op = e, s_scaled

        # att[p] += sum_{q in tile} e[p, q] * s_scaled[q]   -> [1, HW]
        acc_ref[...] += lax.dot_general(s_op, e_op, (((1,), (1,)), ((), ())),
                                        preferred_element_type=jnp.float32)

        @pl.when(qi == last_q)
        def _():
            att = acc_ref[...]                                     # [1, HW]
            att_ref[0] = att.astype(att_ref.dtype)
            out_ref[0] = (att * gamma_ref[0, 0] + x_ref[0]).astype(out_ref.dtype)

    return kernel


def _vmem_estimate(C, HW, O_pad, tq, elem=4):
    """Rough per-grid-step VMEM bytes: double-buffered blocks + scratch + temps."""
    blocks = 2 * (C * HW * elem)                  # x block (double-buffered)
    blocks += 2 * (C * HW * elem)                 # out block
    blocks += 2 * (HW * elem)                     # att block
    blocks += 2 * (O_pad * C * 4 + O_pad * 4)     # weights + biases
    scratch = O_pad * HW * 4 + HW * 4             # fused-conv cache + accumulator
    temps = 3 * HW * tq * 4 + 2 * HW * tq * 2     # logits/e f32 (+slack), bf16 copies
    return blocks + scratch + temps


def _pick_q_tile(HW, C, O_pad, budget_bytes):
    """Largest 128-multiple q tile dividing HW whose working set fits the budget."""
    if HW % 128 != 0:
        return HW                                  # tiny spatial extents
    fixed = _vmem_estimate(C, HW, O_pad, 0)
    per_q = 3 * HW * 4 + 2 * HW * 2                # temp bytes per q lane
    avail = budget_bytes - fixed
    cap = max(128, (avail // per_q) // 128 * 128) if avail > 0 else 128
    best = 128
    d = 128
    while d <= HW:
        if HW % d == 0 and d <= cap:
            best = d
        d += 128
    return best


def self_attention(x_nchw, wf, wg, ws, bf, bg, bs, gamma, *,
                   mxu_bf16=True, q_tile=None, out_dtype=None):
    """x_nchw: [N, C, H, W].  Returns (att_map [N,1,H,W], output [N,C,H,W])."""
    N, C, H, W = x_nchw.shape
    HW = H * W
    C8 = wf.shape[1]
    out_dtype = x_nchw.dtype if out_dtype is None else out_dtype

    # Channel-first, spatially flattened: a FREE reshape (no HBM transpose).
    x = x_nchw.reshape(N, C, HW)

    # Fused, 8-sublane-padded 1x1-conv weights:
    #   rows [0:8)          -> ws^T (1 real row + zero rows)
    #   rows [8:8+P1)       -> wf^T (C8 real rows + zero rows)
    #   rows [8+P1:8+2*P1)  -> wg^T
    # Every segment slice in the kernel starts on an 8-sublane boundary and the
    # zero rows are inert on the MXU (K padding) and in the softmax contraction.
    P1 = _pad8(C8)
    O_pad = 8 + 2 * P1
    wt_cat = jnp.zeros((O_pad, C), jnp.float32)
    wt_cat = wt_cat.at[0:1].set(ws.T)
    wt_cat = wt_cat.at[8:8 + C8].set(wf.T)
    wt_cat = wt_cat.at[8 + P1:8 + P1 + C8].set(wg.T)
    b_cat = jnp.zeros((O_pad, 1), jnp.float32)
    b_cat = b_cat.at[0:1].set(bs.T)
    b_cat = b_cat.at[8:8 + C8].set(bf.T)
    b_cat = b_cat.at[8 + P1:8 + P1 + C8].set(bg.T)

    # Generation-aware VMEM budget (v7x: 64 MiB/TC, v5e/v6e: 128 MiB).
    try:
        vmem_cap = int(pltpu.get_tpu_info().vmem_capacity_bytes)
    except Exception:  # pragma: no cover - conservative fallback (v7x)
        vmem_cap = 64 * _MIB
    budget = (vmem_cap * 3) // 8                   # ~24 MiB v7x, ~48 MiB v5e/v6e

    if q_tile is not None:
        if HW % q_tile != 0:
            raise ValueError("q_tile must divide H*W")
        tq = q_tile
    else:
        tq = _pick_q_tile(HW, C, O_pad, budget)
    nq = HW // tq

    est = _vmem_estimate(C, HW, O_pad, tq)
    if est > 12 * _MIB:
        # Never exceed physical VMEM minus headroom (v7x has only 64 MiB).
        vmem_limit = int(min(max(2 * est, 32 * _MIB), vmem_cap - 8 * _MIB))
    else:
        vmem_limit = None

    kernel = _make_kernel(tq, P1, mxu_bf16)

    att_flat, out_flat = pl.pallas_call(
        kernel,
        out_shape=(
            jax.ShapeDtypeStruct((N, 1, HW), out_dtype),
            jax.ShapeDtypeStruct((N, C, HW), out_dtype),
        ),
        grid_spec=pltpu.PrefetchScalarGridSpec(
            num_scalar_prefetch=0,
            grid=(N, nq),                                            # q-axis last
            in_specs=[
                pl.BlockSpec((1, C, HW), lambda n, q: (n, 0, 0)),    # x (resident over q)
                pl.BlockSpec((O_pad, C), lambda n, q: (0, 0)),       # fused weights
                pl.BlockSpec((O_pad, 1), lambda n, q: (0, 0)),       # fused biases
                pl.BlockSpec((1, 1), lambda n, q: (0, 0),
                             memory_space=pltpu.MemorySpace.SMEM),   # gamma
            ],
            out_specs=[
                pl.BlockSpec((1, 1, HW), lambda n, q: (n, 0, 0)),    # att (lane-dense)
                pl.BlockSpec((1, C, HW), lambda n, q: (n, 0, 0)),    # out (lane-dense)
            ],
            scratch_shapes=[
                pltpu.VMEM((O_pad, HW), jnp.float32),                # fused-conv cache
                pltpu.VMEM((1, HW), jnp.float32),                    # att accumulator
            ],
        ),
        compiler_params=pltpu.CompilerParams(
            dimension_semantics=("parallel", "arbitrary"),
            vmem_limit_bytes=vmem_limit),
    )(x, wt_cat, b_cat, gamma)

    # Free reshapes only -- no wrapper-side transposes.
    att_map = att_flat.reshape(N, 1, H, W)
    output = out_flat.reshape(N, C, H, W)
    return att_map, output


def _reference(x_nchw, wf, wg, ws, bf, bg, bs, gamma):
    N, C, H, W = x_nchw.shape
    HW = H * W
    x = jnp.transpose(x_nchw.reshape(N, C, HW), (0, 2, 1))  # [N, HW, C]
    f = x @ wf + bf                                         # [N, HW, C8]
    g = x @ wg + bg
    s = x @ ws + bs                                         # [N, HW, 1]
    beta = jnp.einsum('npc,nqc->npq', f, g)                 # [N, HW, HW]
    beta = jax.nn.softmax(beta, axis=1)                     # torch dim=1
    att = jnp.einsum('npq,nqo->npo', beta, s)               # [N, HW, 1]
    att_map = att.reshape(N, 1, H, W)
    out = att_map * gamma[0, 0] + x_nchw
    return att_map, out


if __name__ == "__main__":
    key = jax.random.PRNGKey(0)
    N, C, H, W = 2, 16, 16, 16          # C // 8 = 2
    C8 = C // 8

    ks = jax.random.split(key, 8)
    x = jax.random.normal(ks[0], (N, C, H, W), jnp.float32)
    wf = jax.random.normal(ks[1], (C, C8), jnp.float32) * 0.1
    wg = jax.random.normal(ks[2], (C, C8), jnp.float32) * 0.1
    ws = jax.random.normal(ks[3], (C, 1), jnp.float32) * 0.1
    bf = jax.random.normal(ks[4], (1, C8), jnp.float32) * 0.1
    bg = jax.random.normal(ks[5], (1, C8), jnp.float32) * 0.1
    bs = jax.random.normal(ks[6], (1, 1), jnp.float32) * 0.1
    # SAGAN initializes gamma to 0 (the torch FloatTensor(0) is an empty
    # tensor; we treat gamma as a scalar parameter).  Use a NONZERO value so
    # the att*gamma + x broadcast path is actually exercised by the check.
    gamma = jnp.full((1, 1), 0.5, jnp.float32)

    ref_att, ref_out = _reference(x, wf, wg, ws, bf, bg, bs, gamma)

    # Default config: auto q-tile, bf16 MXU operands with f32 accumulation.
    att_map, output = self_attention(x, wf, wg, ws, bf, bg, bs, gamma)
    jax.block_until_ready((att_map, output))
    assert att_map.shape == (N, 1, H, W) and output.shape == (N, C, H, W)
    # 2e-2 tolerance: bf16 MXU operands + EUP approximate reciprocal; all
    # accumulation and the max/colsum reductions stay in f32.
    assert jnp.allclose(att_map, ref_att, atol=2e-2, rtol=2e-2), "att_map mismatch"
    assert jnp.allclose(output, ref_out, atol=2e-2, rtol=2e-2), "output mismatch"

    # Forced q-tiling (2 q-steps at HW=256) to exercise the per-q-tile
    # softmax + accumulator path that kicks in for large HW on v7x.
    att_q, out_q = self_attention(x, wf, wg, ws, bf, bg, bs, gamma, q_tile=128)
    jax.block_until_ready((att_q, out_q))
    assert jnp.allclose(att_q, ref_att, atol=2e-2, rtol=2e-2), "att_map mismatch (q-tiled)"
    assert jnp.allclose(out_q, ref_out, atol=2e-2, rtol=2e-2), "output mismatch (q-tiled)"

    print("KERNEL_OK")
</pallas_src>

<mosaic_0001>
module attributes {stable_mosaic.version = 11 : i64} {
  func.func @kernel(%arg0: i32, %arg1: i32, %arg2: memref<1x16x256xf32, #tpu.memory_space<vmem>>, %arg3: memref<24x16xf32, #tpu.memory_space<vmem>>, %arg4: memref<24x1xf32, #tpu.memory_space<vmem>>, %arg5: memref<1x1xf32, #tpu.memory_space<smem>>, %arg6: memref<1x1x256xf32, #tpu.memory_space<vmem>>, %arg7: memref<1x16x256xf32, #tpu.memory_space<vmem>>, %arg8: memref<24x256xf32, #tpu.memory_space<vmem>>, %arg9: memref<1x256xf32, #tpu.memory_space<vmem>>) attributes {dimension_semantics = [#tpu.dimension_semantics<parallel>, #tpu.dimension_semantics<arbitrary>], iteration_bounds = array<i64: 2, 1>, scalar_prefetch = 0 : i64, scratch_operands = 2 : i64, tpu.core_type = #tpu.core_type<tc>, window_params = [{transform_indices = @transform_0, window_bounds = array<i64: 1, 16, 256>}, {pipeline_mode = #tpu.pipeline_mode<synchronous>, transform_indices = @transform_1, window_bounds = array<i64: 24, 16>}, {pipeline_mode = #tpu.pipeline_mode<synchronous>, transform_indices = @transform_2, window_bounds = array<i64: 24, 1>}, {transform_indices = @transform_3, window_bounds = array<i64: 1, 1>}, {transform_indices = @transform_4, window_bounds = array<i64: 1, 1, 256>}, {transform_indices = @transform_5, window_bounds = array<i64: 1, 16, 256>}]} {
    %c0_i32 = arith.constant 0 : i32
    %0 = arith.cmpi eq, %arg1, %c0_i32 : i32
    %1 = arith.extui %0 : i1 to i32
    %c0_i32_0 = arith.constant 0 : i32
    %2 = arith.cmpi ne, %1, %c0_i32_0 : i32
    scf.if %2 {
      %c0_11 = arith.constant 0 : index
      %c0_12 = arith.constant 0 : index
      %c0_13 = arith.constant 0 : index
      %31 = vector.load %arg2[%c0_11, %c0_12, %c0_13] : memref<1x16x256xf32, #tpu.memory_space<vmem>>, vector<1x16x256xf32>
      %32 = vector.shape_cast %31 : vector<1x16x256xf32> to vector<16x256xf32>
      %c0_14 = arith.constant 0 : index
      %c0_15 = arith.constant 0 : index
      %33 = vector.load %arg3[%c0_14, %c0_15] : memref<24x16xf32, #tpu.memory_space<vmem>>, vector<24x16xf32>
      %cst_16 = arith.constant dense<0.000000e+00> : vector<24x256xf32>
      %34 = tpu.matmul %33, %32, %cst_16 {dimension_numbers = #tpu.dot_dimension_numbers<[1], [0], [0], [1], [0, 0, 1, 1], [], []>} : vector<24x16xf32>, vector<16x256xf32>, vector<24x256xf32> -> vector<24x256xf32>
      %c0_17 = arith.constant 0 : index
      %c0_18 = arith.constant 0 : index
      %35 = vector.load %arg4[%c0_17, %c0_18] : memref<24x1xf32, #tpu.memory_space<vmem>>, vector<24x1xf32>
      %36 = vector.broadcast %35 : vector<24x1xf32> to vector<24x256xf32>
      %37 = arith.addf %34, %36 : vector<24x256xf32>
      %c0_19 = arith.constant 0 : index
      %c0_20 = arith.constant 0 : index
      %38 = vector.load %arg8[%c0_19, %c0_20] : memref<24x256xf32, #tpu.memory_space<vmem>>, vector<24x256xf32>
      tpu.vector_store %arg8[%c0_19, %c0_20], %37 {strides = array<i32>} : memref<24x256xf32, #tpu.memory_space<vmem>>, vector<24x256xf32>,
      %cst_21 = arith.constant 0.000000e+00 : f32
      %39 = vector.broadcast %cst_21 : f32 to vector<1x256xf32>
      %c0_22 = arith.constant 0 : index
      %c0_23 = arith.constant 0 : index
      %40 = vector.load %arg9[%c0_22, %c0_23] : memref<1x256xf32, #tpu.memory_space<vmem>>, vector<1x256xf32>
      tpu.vector_store %arg9[%c0_22, %c0_23], %39 {strides = array<i32>} : memref<1x256xf32, #tpu.memory_space<vmem>>, vector<1x256xf32>,
    } else {
    }
    %c256_i32 = arith.constant 256 : i32
    %3 = arith.muli %arg1, %c256_i32 : i32
    %4 = tpu.assume_multiple %3, 256 : i32
    %c8 = arith.constant 8 : index
    %c0 = arith.constant 0 : index
    %5 = vector.load %arg8[%c8, %c0] : memref<24x256xf32, #tpu.memory_space<vmem>>, vector<8x256xf32>
    %c16 = arith.constant 16 : index
    %6 = arith.index_cast %4 : i32 to index
    %7 = vector.load %arg8[%c16, %6] : memref<24x256xf32, #tpu.memory_space<vmem>>, vector<8x256xf32>
    %c0_1 = arith.constant 0 : index
    %8 = arith.index_cast %4 : i32 to index
    %9 = vector.load %arg8[%c0_1, %8] : memref<24x256xf32, #tpu.memory_space<vmem>>, vector<1x256xf32>
    %10 = arith.truncf %5 : vector<8x256xf32> to vector<8x256xbf16>
    %11 = arith.truncf %7 : vector<8x256xf32> to vector<8x256xbf16>
    %cst = arith.constant dense<0.000000e+00> : vector<256x256xf32>
    %12 = tpu.matmul %10, %11, %cst {dimension_numbers = #tpu.dot_dimension_numbers<[0], [0], [1], [1], [0, 1, 1, 1], [], []>} : vector<8x256xbf16>, vector<8x256xbf16>, vector<256x256xf32> -> vector<256x256xf32>
    %cst_2 = arith.constant dense<0xFF800000> : vector<256xf32>
    %13 = vector.multi_reduction <maximumf>, %12, %cst_2 [0] : vector<256x256xf32> to vector<256xf32>
    %14 = vector.shape_cast %13 : vector<256xf32> to vector<1x256xf32>
    %15 = vector.broadcast %14 : vector<1x256xf32> to vector<256x256xf32>
    %16 = arith.subf %12, %15 : vector<256x256xf32>
    %17 = math.exp %16 : vector<256x256xf32>
    %cst_3 = arith.constant dense<0.000000e+00> : vector<256xf32>
    %18 = vector.multi_reduction <add>, %17, %cst_3 [0] : vector<256x256xf32> to vector<256xf32>
    %19 = vector.shape_cast %18 : vector<256xf32> to vector<1x256xf32>
    %20 = tpu.reciprocal %19 {approx = true} : vector<1x256xf32> -> vector<1x256xf32>
    %21 = arith.mulf %9, %20 : vector<1x256xf32>
    %22 = arith.truncf %17 : vector<256x256xf32> to vector<256x256xbf16>
    %23 = arith.truncf %21 : vector<1x256xf32> to vector<1x256xbf16>
    %c0_4 = arith.constant 0 : index
    %c0_5 = arith.constant 0 : index
    %24 = vector.load %arg9[%c0_4, %c0_5] : memref<1x256xf32, #tpu.memory_space<vmem>>, vector<1x256xf32>
    %cst_6 = arith.constant dense<0.000000e+00> : vector<1x256xf32>
    %25 = tpu.matmul %23, %22, %cst_6 {dimension_numbers = #tpu.dot_dimension_numbers<[1], [1], [0], [0], [0, 0, 1, 0], [], []>} : vector<1x256xbf16>, vector<256x256xbf16>, vector<1x256xf32> -> vector<1x256xf32>
    %26 = arith.addf %24, %25 : vector<1x256xf32>
    %c0_7 = arith.constant 0 : index
    %c0_8 = arith.constant 0 : index
    %27 = vector.load %arg9[%c0_7, %c0_8] : memref<1x256xf32, #tpu.memory_space<vmem>>, vector<1x256xf32>
    tpu.vector_store %arg9[%c0_7, %c0_8], %26 {strides = array<i32>} : memref<1x256xf32, #tpu.memory_space<vmem>>, vector<1x256xf32>,
    %c0_i32_9 = arith.constant 0 : i32
    %28 = arith.cmpi eq, %arg1, %c0_i32_9 : i32
    %29 = arith.extui %28 : i1 to i32
    %c0_i32_10 = arith.constant 0 : i32
    %30 = arith.cmpi ne, %29, %c0_i32_10 : i32
    scf.if %30 {
      %c0_11 = arith.constant 0 : index
      %c0_12 = arith.constant 0 : index
      %31 = vector.load %arg9[%c0_11, %c0_12] : memref<1x256xf32, #tpu.memory_space<vmem>>, vector<1x256xf32>
      %c0_13 = arith.constant 0 : index
      %c0_14 = arith.constant 0 : index
      %c0_15 = arith.constant 0 : index
      %32 = vector.load %arg6[%c0_13, %c0_14, %c0_15] : memref<1x1x256xf32, #tpu.memory_space<vmem>>, vector<1x1x256xf32>
      %33 = vector.shape_cast %32 : vector<1x1x256xf32> to vector<1x256xf32>
      %34 = vector.shape_cast %31 : vector<1x256xf32> to vector<1x1x256xf32>
      tpu.vector_store %arg6[%c0_13, %c0_14, %c0_15], %34 {strides = array<i32>} : memref<1x1x256xf32, #tpu.memory_space<vmem>>, vector<1x1x256xf32>,
      %c0_16 = arith.constant 0 : index
      %c0_17 = arith.constant 0 : index
      %35 = memref.load %arg5[%c0_16, %c0_17] : memref<1x1xf32, #tpu.memory_space<smem>>
      %36 = vector.broadcast %35 : f32 to vector<1x256xf32>
      %37 = arith.mulf %31, %36 : vector<1x256xf32>
      %c0_18 = arith.constant 0 : index
      %c0_19 = arith.constant 0 : index
      %c0_20 = arith.constant 0 : index
      %38 = vector.load %arg2[%c0_18, %c0_19, %c0_20] : memref<1x16x256xf32, #tpu.memory_space<vmem>>, vector<1x16x256xf32>
      %39 = vector.shape_cast %38 : vector<1x16x256xf32> to vector<16x256xf32>
      %40 = vector.broadcast %37 : vector<1x256xf32> to vector<16x256xf32>
      %41 = arith.addf %40, %39 : vector<16x256xf32>
      %c0_21 = arith.constant 0 : index
      %c0_22 = arith.constant 0 : index
      %c0_23 = arith.constant 0 : index
      %42 = vector.load %arg7[%c0_21, %c0_22, %c0_23] : memref<1x16x256xf32, #tpu.memory_space<vmem>>, vector<1x16x256xf32>
      %43 = vector.shape_cast %42 : vector<1x16x256xf32> to vector<16x256xf32>
      %44 = vector.shape_cast %41 : vector<16x256xf32> to vector<1x16x256xf32>
      tpu.vector_store %arg7[%c0_21, %c0_22, %c0_23], %44 {strides = array<i32>} : memref<1x16x256xf32, #tpu.memory_space<vmem>>, vector<1x16x256xf32>,
    } else {
    }
    return
  }
  func.func @transform_0(%arg0: i32, %arg1: i32) -> (i32, i32, i32) {
    %c0_i32 = arith.constant 0 : i32
    %c0_i32_0 = arith.constant 0 : i32
    %c0_i32_1 = arith.constant 0 : i32
    return %arg0, %c0_i32, %c0_i32_0 : i32, i32, i32
  }
  func.func @transform_1(%arg0: i32, %arg1: i32) -> (i32, i32) {
    %c0_i32 = arith.constant 0 : i32
    %c0_i32_0 = arith.constant 0 : i32
    %c0_i32_1 = arith.constant 0 : i32
    return %c0_i32, %c0_i32_0 : i32, i32
  }
  func.func @transform_2(%arg0: i32, %arg1: i32) -> (i32, i32) {
    %c0_i32 = arith.constant 0 : i32
    %c0_i32_0 = arith.constant 0 : i32
    %c0_i32_1 = arith.constant 0 : i32
    return %c0_i32, %c0_i32_0 : i32, i32
  }
  func.func @transform_3(%arg0: i32, %arg1: i32) -> (i32, i32) {
    %c0_i32 = arith.constant 0 : i32
    %c0_i32_0 = arith.constant 0 : i32
    %c0_i32_1 = arith.constant 0 : i32
    return %c0_i32, %c0_i32_0 : i32, i32
  }
  func.func @transform_4(%arg0: i32, %arg1: i32) -> (i32, i32, i32) {
    %c0_i32 = arith.constant 0 : i32
    %c0_i32_0 = arith.constant 0 : i32
    %c0_i32_1 = arith.constant 0 : i32
    return %arg0, %c0_i32, %c0_i32_0 : i32, i32, i32
  }
  func.func @transform_5(%arg0: i32, %arg1: i32) -> (i32, i32, i32) {
    %c0_i32 = arith.constant 0 : i32
    %c0_i32_0 = arith.constant 0 : i32
    %c0_i32_1 = arith.constant 0 : i32
    return %arg0, %c0_i32, %c0_i32_0 : i32, i32, i32
  }
}

</mosaic_0001>

<bundles_post_ra>
// kernel: tpu_custom_call.1
= control target key start
LH: loop header
LB: loop body
LE: loop exit
PB: predicated region body
PF: predicated region fallthrough
CT: control target
= control target key end

     0   :  { %s2727_s0 = inlined_call_operand.vmem [shape: f32[2,16,256], index: 0, kind: input, shape index: {}]   ;;  %s2728_s1 = inlined_call_operand.vmem [shape: f32[24,16], index: 1, kind: input, shape index: {}]   ;;  %s2729_s2 = inlined_call_operand.vmem [shape: f32[24,1], index: 2, kind: input, shape index: {}]   ;;  %s2730_s3 = inlined_call_operand.<no memory space> [shape: f32[1,1], index: 3, kind: input, shape index: {}]   ;;  %s2731_s4 = inlined_call_operand.hbm [shape: f32[2,1,256], index: 4, kind: output, shape index: {0}]   ;;  %s2732_s5 = inlined_call_operand.hbm [shape: f32[2,16,256], index: 5, kind: output, shape index: {1}]  }
   0x1   :  { %11 = sst [smem:[#allocation4]] %s2730_s3 }
   0x2   :  { %12 = vsyncpa [#allocation6], 0 }
   0x3   :  { %14 = vsyncpa [#allocation6 + $0x1], 0 }
   0x4   :  { %15 = vsyncpa [#allocation8], 0 }
   0x5   :  { %17 = vsyncpa [#allocation8 + $0x1], 0  ;;  %s1710_s20 = smov 0   ;;  %s1712_s21 = smov 0  }
   0x6   :  { %s1714_s22 = smov 0   ;;  %s1716_s23 = smov 0  }
   0x7   :  { %s1718_s24 = smov 0   ;;  %s1720_s25 = smov 0  }
   0x8 LB: > { %s1316_s3 = sadd.s32 4294967295, %s1668_s25   ;;  %s1317_s26 = sadd.s32 4294967294, %s1668_s25   ;;  %s1668_s25 = sphi %s1720_s25, %s23_s25   ;;  %s1664_s24 = sphi %s1718_s24, %s2889_s24   ;;  %s1660_s23 = sphi %s1716_s23, %s2888_s23   ;;  %s1656_s22 = sphi %s1714_s22, %s2887_s22   ;;  %s1652_s21 = sphi %s1712_s21, %s2886_s21   ;;  %s1648_s20 = sphi %s1710_s20, %s2885_s20  }
   0x9   : > { %s35_s27 = sadd.s32 1, %s1664_s24  ;;  %s131_s28 = sadd.s32 1, %s1656_s22 }
   0xa   : > { %p37_p0 = scmp.ge.s32.totalorder %s35_s27, 2  ;;  %p141_p1 = scmp.ne.s32.totalorder %s1656_s22, %s1652_s21 }
   0xb   : > { %p142_p2 = scmp.eq.s32.totalorder %s1316_s3, 1  ;;  %p147_p3 = scmp.ne.s32.totalorder %s1652_s21, %s1648_s20 }
   0xc   : > { %s2891_s27 = smov (%p37_p0, %s35_s27), 0  ;;  %p148_p5 = scmp.eq.s32.totalorder %s1317_s26, 1 }
   0xd   : > { %p1750_p4 = por %p142_p2, %p141_p1  ;;  %s128_s30 = ssub.s32 %s1664_s24, %s2891_s27 }
   0xe   : > { %p1320_p6 = scmp.ge.s32.totalorder %s1668_s25, 1  ;;  %p129_p7 = scmp.eq.s32.totalorder %s128_s30, 0 }
   0xf   : > { %p1757_p8 = por %p148_p5, %p147_p3  ;;  %p209_p9 = scmp.lt.s32.totalorder %s1668_s25, 3 }
  0x10   : > { %s1763_s7 = scalar_select %p129_p7, %s1656_s22, %s131_s28  }
  0x11   : > { %p210_p10 = pnand %p1320_p6, %p209_p9 }
  0x13   : > { %213 = sbr.rel (%p210_p10) target bundleno = 1164 (0x48c), region = 36 }
  0x1a   : > { %p242_p11 = scmp.lt.s32.totalorder %s1660_s23, 1  ;;  %v2733_v0 = vmov 0.0   ;;  %v260_v1 = vld [vmem:[%s2729_s2 + $0x8] sm:$0xff]  ;;  %v1671_v2 = vmov 0   ;;  %v261_v3 = vld [vmem:[%s2729_s2 + $0x10] sm:$0xff]  ;;  %v259_v10 = vld [vmem:[%s2729_s2] sm:$0xff] }
  0x1b   : > { %351 = vmatprep.mubr.f32.mxu0 %v2733_v0  ;;  %1425 = vset.pattern.permute.xlu0 %v1671_v2  ;;  %v256_v11 = vld [vmem:[%s2728_s1] sm:$0xff]  ;;  %vm277_vm0 = vcmask 130048   ;;  %v257_v12 = vld [vmem:[%s2728_s1 + $0x8] sm:$0xff]  ;;  %v258_v13 = vld [vmem:[%s2728_s1 + $0x10] sm:$0xff]  ;;  %vm476_vm1 = vcmask 1043456   ;;  %vm427_vm2 = vcmask 64512  }
  0x1c   : > { %s243_s10 = scalar_select %p242_p11, %s1660_s23, 1  ;;  %515 = vmatprep.mubr.bf16.mxu1 %v1671_v2  ;;  %269 = vperm.xlu0 %1425, %v260_v1  }
  0x1d   : > { %s2616_s9 = sand.u32 1, %s1652_s21   ;;  %s1354_s13 = sshll.u32 %s1660_s23, 5 }
  0x1e   : > { %s1353_s11 = sshll.u32 %s243_s10, 5  ;;  %s1153_s10 = sld [smem:[#allocation4]] }
  0x1f   : > { %s1779_s16 = scalar_lea.vmem %s2727_s0, %s1353_s11  ;;  %s1321_s11 = sshll.u32 %s2616_s9, 1 }
  0x20   : > { %v253_v4 = vld [vmem:[%s1779_s16 + $0x8] sm:$0xff]  ;;  %v255_v5 = vld [vmem:[%s1779_s16 + $0x18] sm:$0xff]  ;;  %v252_v6 = vld [vmem:[%s1779_s16] sm:$0xff]  ;;  %274 = vperm.xlu0 %1425, %v261_v3   ;;  %s1322_s12 = sshll.u32 %s2616_s9, 5  ;;  %s234_s14 = scalar_lea.vmem [#allocation5], %s1321_s11 }
  0x21   : > { %v1356_v7 = vpack.c.bf16 %v255_v5, %v253_v4  ;;  %v254_v8 = vld [vmem:[%s1779_s16 + $0x10] sm:$0xff]  ;;  %s1199_s15 = sshll.u32 %s234_s14, 4  ;;  %s2626_s19 = scalar_lea.hbm %s2731_s4, %s1354_s13  ;;  %s2628_s15 = int_to_ptr.vmem [resolvable:$true] %s1199_s15 }
  0x22   : > { %v1358_v9 = vpack.c.bf16 %v254_v8, %v252_v6  ;;  %s2633_s3 = scalar_lea.vmem [#allocation7], %s1322_s12  ;;  %s1355_s28 = sshll.u32 %s1660_s23, 9 }
  0x23   : > { %1357 = vmatprep.subr.bf16.mxu0 %v1356_v7  ;;  %s1212_s26 = sshll.u32 %s2633_s3, 4  ;;  %s1180_s30 = scalar_lea.sflag [#allocation6], %s2616_s9  ;;  %s2668_s26 = int_to_ptr.vmem [resolvable:$true] %s1212_s26 }
  0x24   : > { %1359 = vmatpush1.bf16.msra.mxu0 %v1358_v9  ;;  %264 = vperm.xlu0 %1425, %v259_v10   ;;  %s1558_s8 = scalar_lea.vmem %s2628_s15, 32 }
  0x25   : > { %p1559_p12 = scmp.ne.s32.totalorder %s2628_s15, %s1558_s8 }
  0x27   : > { %1325 = vmatmul.mubr.msk.f32.vlgmr.msra.gmra.mrb[0].mxu0 %vm277_vm0, %v256_v11  ;;  %p1560_p13 = pnand %p1559_p12, %p1750_p4 }
  0x28   : > { %357 = vmatprep.mubr.f32.mxu0 %v2733_v0 }
  0x29   : > { %p1561_p0 = pneg %p1560_p13 }
  0x2b   : > { %1326 = vmatmul.mubr.msk.f32.gmra.mrb[2].mxu0 %vm277_vm0, %v257_v12 }
  0x2c   : > { %363 = vmatprep.mubr.f32.mxu0 %v2733_v0 }
  0x2f   : > { %1327 = vmatmul.mubr.msk.f32.gmra.mrb[4].mxu0 %vm277_vm0, %v258_v13 }
  0x9b   : > { %v270_v14 = vpop.permute.xlu0 %269 }
  0x9f   : > { %v275_v15 = vpop.permute.xlu0 %274 }
  0xa3   : > { %v265_v16 = vpop.permute.xlu0 %264 }
  0xfa   : > { %v353_v17 = vpop.f32.mrb[0].mxu0 }
  0xfb   : > { %v354_v18 = vadd.f32 %v353_v17, %v265_v16  ;;  %v355_v19 = vpop.f32.mrb[1].mxu0 }
  0xfc   : > { %v356_v20 = vadd.f32 %v355_v19, %v265_v16 }
  0xfd   : > { %370 = vst [vmem:[#allocation2] sm:$0xff] %v354_v18 }
  0xfe   : > { %371 = vst [vmem:[#allocation2 + $0x8] sm:$0xff] %v356_v20  ;;  %v359_v21 = vpop.f32.mrb[2].mxu0 }
  0xff   : > { %v360_v22 = vadd.f32 %v359_v21, %v270_v14  ;;  %v361_v23 = vpop.f32.mrb[3].mxu0 }
 0x100   : > { %v362_v24 = vadd.f32 %v361_v23, %v270_v14 }
 0x101   : > { %v391_v25 = vpack.c.bf16 %v360_v22, %v360_v22 }
 0x102   : > { %v365_v26 = vpop.f32.mrb[4].mxu0  ;;  %v392_v33 = vpack.c.bf16 %v362_v24, %v362_v24 }
 0x103   : > { %v366_v27 = vadd.f32 %v365_v26, %v275_v15  ;;  %v367_v28 = vpop.f32.mrb[5].mxu0  ;;  %395 = vxpose.xlu1.c.b16.start.end [1/1] (short) %v391_v25, 128 }
 0x104   : > { %v368_v29 = vadd.f32 %v367_v28, %v275_v15 }
 0x105   : > { %v393_v30 = vpack.c.bf16 %v366_v27, %v366_v27 }
 0x106   : > { %v394_v31 = vpack.c.bf16 %v368_v29, %v368_v29 }
 0x107   : > { %v478_v32 = vsel %vm476_vm1, %v393_v30, 0 }
 0x108   : > { %1328 = vmatprep.subr.msk.bf16.mxu1 %vm476_vm1, %v394_v31 }
 0x109   : > { %484 = vmatpush1.bf16.msra.mxu1 %v478_v32 }
 0x120   : > { %411 = vxpose.xlu1.c.b16.start.end [1/1] (short) %v392_v33, 128 }
 0x169   : > { %v403_v34 = vpop.trf.xlu1 }
 0x16a   : > { %1329 = vmatmul.mubr.msk.bf16.vlgmr.msra.gmra.mrb[0].mxu1 %vm427_vm2, %v403_v34 }
 0x16b   : > { %525 = vmatprep.mubr.bf16.mxu1 %v1671_v2 }
 0x16d   : > { %v404_v35 = vpop.trf.xlu1 }
 0x171   : > { %v405_v36 = vpop.trf.xlu1 }
 0x172   : > { %1330 = vmatmul.mubr.msk.bf16.gmra.mrb[4].mxu1 %vm427_vm2, %v404_v35 }
 0x173   : > { %535 = vmatprep.mubr.bf16.mxu1 %v1671_v2 }
 0x175   : > { %v406_v37 = vpop.trf.xlu1 }
 0x179   : > { %v407_v38 = vpop.trf.xlu1 }
 0x17a   : > { %1331 = vmatmul.mubr.msk.bf16.gmra.mrb[8].mxu1 %vm427_vm2, %v405_v36 }
 0x17b   : > { %545 = vmatprep.mubr.bf16.mxu1 %v1671_v2 }
 0x17d   : > { %v408_v39 = vpop.trf.xlu1 }
 0x181   : > { %v409_v40 = vpop.trf.xlu1 }
 0x182   : > { %1332 = vmatmul.mubr.msk.bf16.gmra.mrb[12].mxu1 %vm427_vm2, %v406_v37 }
 0x183   : > { %555 = vmatprep.mubr.bf16.mxu1 %v1671_v2 }
 0x185   : > { %v410_v41 = vpop.trf.xlu1 }
 0x189   : > { %v419_v42 = vpop.trf.xlu1 }
 0x18a   : > { %1333 = vmatmul.mubr.msk.bf16.gmra.mrb[16].mxu1 %vm427_vm2, %v407_v38 }
 0x18b   : > { %565 = vmatprep.mubr.bf16.mxu1 %v1671_v2 }
 0x18d   : > { %v420_v43 = vpop.trf.xlu1 }
 0x191   : > { %v421_v44 = vpop.trf.xlu1 }
 0x192   : > { %1334 = vmatmul.mubr.msk.bf16.gmra.mrb[20].mxu1 %vm427_vm2, %v408_v39 }
 0x193   : > { %575 = vmatprep.mubr.bf16.mxu1 %v1671_v2 }
 0x195   : > { %v422_v45 = vpop.trf.xlu1 }
 0x199   : > { %v423_v46 = vpop.trf.xlu1 }
 0x19a   : > { %1335 = vmatmul.mubr.msk.bf16.gmra.mrb[24].mxu1 %vm427_vm2, %v409_v40 }
 0x19b   : > { %585 = vmatprep.mubr.bf16.mxu1 %v1671_v2 }
 0x19d   : > { %v424_v47 = vpop.trf.xlu1 }
 0x1a1   : > { %v425_v48 = vpop.trf.xlu1 }
 0x1a2   : > { %1336 = vmatmul.mubr.msk.bf16.gmra.mrb[28].mxu1 %vm427_vm2, %v410_v41 }
 0x1a3   : > { %595 = vmatprep.mubr.bf16.mxu1 %v1671_v2 }
 0x1a5   : > { %v426_v49 = vpop.trf.xlu1 }
 0x1aa   : > { %1337 = vmatmul.mubr.msk.bf16.gmra.mrb[32].mxu1 %vm427_vm2, %v419_v42 }
 0x1ab   : > { %605 = vmatprep.mubr.bf16.mxu1 %v1671_v2 }
 0x1b2   : > { %1338 = vmatmul.mubr.msk.bf16.gmra.mrb[36].mxu1 %vm427_vm2, %v420_v43 }
 0x1b3   : > { %615 = vmatprep.mubr.bf16.mxu1 %v1671_v2 }
 0x1ba   : > { %1339 = vmatmul.mubr.msk.bf16.gmra.mrb[40].mxu1 %vm427_vm2, %v421_v44 }
 0x1bb   : > { %625 = vmatprep.mubr.bf16.mxu1 %v1671_v2 }
 0x1c2   : > { %1340 = vmatmul.mubr.msk.bf16.gmra.mrb[44].mxu1 %vm427_vm2, %v422_v45 }
 0x1c3   : > { %635 = vmatprep.mubr.bf16.mxu1 %v1671_v2 }
 0x1ca   : > { %1341 = vmatmul.mubr.msk.bf16.gmra.mrb[48].mxu1 %vm427_vm2, %v423_v46 }
 0x1cb   : > { %645 = vmatprep.mubr.bf16.mxu1 %v1671_v2 }
 0x1d2   : > { %1342 = vmatmul.mubr.msk.bf16.gmra.mrb[52].mxu1 %vm427_vm2, %v424_v47 }
 0x1d3   : > { %655 = vmatprep.mubr.bf16.mxu1 %v1671_v2 }
 0x1da   : > { %1343 = vmatmul.mubr.msk.bf16.gmra.mrb[56].mxu1 %vm427_vm2, %v425_v48 }
 0x1db   : > { %665 = vmatprep.mubr.bf16.mxu1 %v1671_v2 }
 0x1e2   : > { %1344 = vmatmul.mubr.msk.bf16.gmra.mrb[60].mxu1 %vm427_vm2, %v426_v49 }
 0x23d   : > { %v1830_v50 = vpop.f32.mrb[0].mxu1 }
 0x23e   : > { %v1832_v51 = vpop.f32.mrb[1].mxu1 }
 0x23f   : > { %v1834_v52 = vpop.f32.mrb[2].mxu1 }
 0x240   : > { %v1836_v53 = vpop.f32.mrb[3].mxu1 }
 0x245   : > { %v1838_v54 = vpop.f32.mrb[4].mxu1 }
 0x246   : > { %v676_v55 = vmax.f32 %v1830_v50, %v1838_v54  ;;  %v1842_v56 = vpop.f32.mrb[5].mxu1 }
 0x247   : > { %v713_v57 = vmax.f32 %v1832_v51, %v1842_v56  ;;  %v1846_v58 = vpop.f32.mrb[6].mxu1 }
 0x248   : > { %v677_v59 = vmax.f32 %v1834_v52, %v1846_v58  ;;  %v1850_v60 = vpop.f32.mrb[7].mxu1 }
 0x249   : > { %v714_v61 = vmax.f32 %v1836_v53, %v1850_v60 }
 0x24d   : > { %v1854_v62 = vpop.f32.mrb[8].mxu1 }
 0x24e   : > { %v678_v63 = vmax.f32 %v676_v55, %v1854_v62  ;;  %v1857_v1 = vpop.f32.mrb[9].mxu1 }
 0x24f   : > { %v715_v2 = vmax.f32 %v713_v57, %v1857_v1  ;;  %v1860_v3 = vpop.f32.mrb[10].mxu1 }
 0x250   : > { %v679_v4 = vmax.f32 %v677_v59, %v1860_v3  ;;  %v1863_v5 = vpop.f32.mrb[11].mxu1 }
 0x251   : > { %v716_v6 = vmax.f32 %v714_v61, %v1863_v5 }
 0x255   : > { %v1866_v7 = vpop.f32.mrb[12].mxu1 }
 0x256   : > { %v680_v8 = vmax.f32 %v678_v63, %v1866_v7  ;;  %v1869_v9 = vpop.f32.mrb[13].mxu1 }
 0x257   : > { %v717_v10 = vmax.f32 %v715_v2, %v1869_v9  ;;  %v1872_v11 = vpop.f32.mrb[14].mxu1 }
 0x258   : > { %v681_v12 = vmax.f32 %v679_v4, %v1872_v11  ;;  %v1875_v13 = vpop.f32.mrb[15].mxu1 }
 0x259   : > { %v718_v14 = vmax.f32 %v716_v6, %v1875_v13 }
 0x25d   : > { %v1878_v15 = vpop.f32.mrb[16].mxu1 }
 0x25e   : > { %v682_v16 = vmax.f32 %v680_v8, %v1878_v15  ;;  %v1881_v17 = vpop.f32.mrb[17].mxu1 }
 0x25f   : > { %v719_v18 = vmax.f32 %v717_v10, %v1881_v17  ;;  %v1884_v19 = vpop.f32.mrb[18].mxu1 }
 0x260   : > { %v683_v20 = vmax.f32 %v681_v12, %v1884_v19  ;;  %v1887_v21 = vpop.f32.mrb[19].mxu1 }
 0x261   : > { %v720_v22 = vmax.f32 %v718_v14, %v1887_v21 }
 0x265   : > { %v1890_v23 = vpop.f32.mrb[20].mxu1 }
 0x266   : > { %v684_v24 = vmax.f32 %v682_v16, %v1890_v23  ;;  %v1893_v25 = vpop.f32.mrb[21].mxu1 }
 0x267   : > { %v721_v26 = vmax.f32 %v719_v18, %v1893_v25  ;;  %v1896_v27 = vpop.f32.mrb[22].mxu1 }
 0x268   : > { %v685_v28 = vmax.f32 %v683_v20, %v1896_v27  ;;  %v1899_v29 = vpop.f32.mrb[23].mxu1 }
 0x269   : > { %2778 = vst [vmem:[#allocation11_spill] sm:$0xff] %v1899_v29  ;;  %v722_v30 = vmax.f32 %v720_v22, %v1899_v29 }
 0x26d   : > { %v1902_v31 = vpop.f32.mrb[24].mxu1 }
 0x26e   : > { %v686_v32 = vmax.f32 %v684_v24, %v1902_v31  ;;  %v1905_v33 = vpop.f32.mrb[25].mxu1 }
 0x26f   : > { %2779 = vst [vmem:[#allocation12_spill] sm:$0xff] %v1905_v33  ;;  %v723_v34 = vmax.f32 %v721_v26, %v1905_v33  ;;  %v1908_v35 = vpop.f32.mrb[26].mxu1 }
 0x270   : > { %v687_v36 = vmax.f32 %v685_v28, %v1908_v35  ;;  %v1911_v37 = vpop.f32.mrb[27].mxu1 }
 0x271   : > { %2780 = vst [vmem:[#allocation13_spill] sm:$0xff] %v1911_v37  ;;  %v724_v38 = vmax.f32 %v722_v30, %v1911_v37 }
 0x275   : > { %v1914_v39 = vpop.f32.mrb[28].mxu1 }
 0x276   : > { %v688_v40 = vmax.f32 %v686_v32, %v1914_v39  ;;  %v1917_v41 = vpop.f32.mrb[29].mxu1 }
 0x277   : > { %2781 = vst [vmem:[#allocation14_spill] sm:$0xff] %v1917_v41  ;;  %v725_v42 = vmax.f32 %v723_v34, %v1917_v41  ;;  %v1920_v43 = vpop.f32.mrb[30].mxu1 }
 0x278   : > { %v689_v44 = vmax.f32 %v687_v36, %v1920_v43  ;;  %v1923_v45 = vpop.f32.mrb[31].mxu1 }
 0x279   : > { %2782 = vst [vmem:[#allocation15_spill] sm:$0xff] %v1923_v45  ;;  %v726_v46 = vmax.f32 %v724_v38, %v1923_v45 }
 0x27d   : > { %v1926_v47 = vpop.f32.mrb[32].mxu1 }
 0x27e   : > { %v690_v48 = vmax.f32 %v688_v40, %v1926_v47  ;;  %v1929_v49 = vpop.f32.mrb[33].mxu1 }
 0x27f   : > { %2783 = vst [vmem:[#allocation16_spill] sm:$0xff] %v1929_v49  ;;  %v727_v55 = vmax.f32 %v725_v42, %v1929_v49  ;;  %v1932_v57 = vpop.f32.mrb[34].mxu1 }
 0x280   : > { %v691_v59 = vmax.f32 %v689_v44, %v1932_v57  ;;  %v1935_v61 = vpop.f32.mrb[35].mxu1 }
 0x281   : > { %2784 = vst [vmem:[#allocation17_spill] sm:$0xff] %v1935_v61  ;;  %v728_v63 = vmax.f32 %v726_v46, %v1935_v61 }
 0x285   : > { %v1938_v2 = vpop.f32.mrb[36].mxu1 }
 0x286   : > { %v692_v4 = vmax.f32 %v690_v48, %v1938_v2  ;;  %v1941_v6 = vpop.f32.mrb[37].mxu1 }
 0x287   : > { %2785 = vst [vmem:[#allocation18_spill] sm:$0xff] %v1941_v6  ;;  %v729_v8 = vmax.f32 %v727_v55, %v1941_v6  ;;  %v1944_v10 = vpop.f32.mrb[38].mxu1 }
 0x288   : > { %v693_v12 = vmax.f32 %v691_v59, %v1944_v10  ;;  %v1947_v14 = vpop.f32.mrb[39].mxu1 }
 0x289   : > { %2786 = vst [vmem:[#allocation19_spill] sm:$0xff] %v1947_v14  ;;  %v730_v16 = vmax.f32 %v728_v63, %v1947_v14 }
 0x28d   : > { %v1950_v18 = vpop.f32.mrb[40].mxu1 }
 0x28e   : > { %v694_v20 = vmax.f32 %v692_v4, %v1950_v18  ;;  %v1953_v22 = vpop.f32.mrb[41].mxu1 }
 0x28f   : > { %2787 = vst [vmem:[#allocation20_spill] sm:$0xff] %v1953_v22  ;;  %v731_v24 = vmax.f32 %v729_v8, %v1953_v22  ;;  %v1956_v26 = vpop.f32.mrb[42].mxu1 }
 0x290   : > { %v695_v28 = vmax.f32 %v693_v12, %v1956_v26  ;;  %v1959_v30 = vpop.f32.mrb[43].mxu1 }
 0x291   : > { %2788 = vst [vmem:[#allocation21_spill] sm:$0xff] %v1959_v30  ;;  %v732_v32 = vmax.f32 %v730_v16, %v1959_v30 }
 0x295   : > { %v1962_v34 = vpop.f32.mrb[44].mxu1 }
 0x296   : > { %v696_v36 = vmax.f32 %v694_v20, %v1962_v34  ;;  %v1965_v38 = vpop.f32.mrb[45].mxu1 }
 0x297   : > { %2789 = vst [vmem:[#allocation22_spill] sm:$0xff] %v1965_v38  ;;  %v733_v40 = vmax.f32 %v731_v24, %v1965_v38  ;;  %v1968_v42 = vpop.f32.mrb[46].mxu1 }
 0x298   : > { %v697_v44 = vmax.f32 %v695_v28, %v1968_v42  ;;  %v1971_v46 = vpop.f32.mrb[47].mxu1 }
 0x299   : > { %2790 = vst [vmem:[#allocation23_spill] sm:$0xff] %v1971_v46  ;;  %v734_v48 = vmax.f32 %v732_v32, %v1971_v46 }
 0x29d   : > { %v1974_v55 = vpop.f32.mrb[48].mxu1 }
 0x29e   : > { %v698_v59 = vmax.f32 %v696_v36, %v1974_v55  ;;  %v1977_v63 = vpop.f32.mrb[49].mxu1 }
 0x29f   : > { %2791 = vst [vmem:[#allocation24_spill] sm:$0xff] %v1977_v63  ;;  %v735_v4 = vmax.f32 %v733_v40, %v1977_v63  ;;  %v1980_v8 = vpop.f32.mrb[50].mxu1 }
 0x2a0   : > { %v699_v12 = vmax.f32 %v697_v44, %v1980_v8  ;;  %v1983_v16 = vpop.f32.mrb[51].mxu1 }
 0x2a1   : > { %2792 = vst [vmem:[#allocation25_spill] sm:$0xff] %v1983_v16  ;;  %v736_v20 = vmax.f32 %v734_v48, %v1983_v16 }
 0x2a5   : > { %v1986_v24 = vpop.f32.mrb[52].mxu1 }
 0x2a6   : > { %v700_v28 = vmax.f32 %v698_v59, %v1986_v24  ;;  %v1989_v32 = vpop.f32.mrb[53].mxu1 }
 0x2a7   : > { %2793 = vst [vmem:[#allocation26_spill] sm:$0xff] %v1989_v32  ;;  %v737_v36 = vmax.f32 %v735_v4, %v1989_v32  ;;  %v1992_v0 = vpop.f32.mrb[54].mxu1 }
 0x2a8   : > { %v701_v40 = vmax.f32 %v699_v12, %v1992_v0  ;;  %v1995_v63 = vpop.f32.mrb[55].mxu1 }
 0x2a9   : > { %2794 = vst [vmem:[#allocation27_spill] sm:$0xff] %v1995_v63  ;;  %v738_v44 = vmax.f32 %v736_v20, %v1995_v63 }
 0x2ad   : > { %v1998_v46 = vpop.f32.mrb[56].mxu1 }
 0x2ae   : > { %v702_v48 = vmax.f32 %v700_v28, %v1998_v46  ;;  %v2001_v16 = vpop.f32.mrb[57].mxu1 }
 0x2af   : > { %2795 = vst [vmem:[#allocation28_spill] sm:$0xff] %v2001_v16  ;;  %v739_v59 = vmax.f32 %v737_v36, %v2001_v16  ;;  %v2004_v38 = vpop.f32.mrb[58].mxu1 }
 0x2b0   : > { %v703_v4 = vmax.f32 %v701_v40, %v2004_v38  ;;  %v2007_v32 = vpop.f32.mrb[59].mxu1 }
 0x2b1   : > { %2796 = vst [vmem:[#allocation29_spill] sm:$0xff] %v2007_v32  ;;  %v740_v12 = vmax.f32 %v738_v44, %v2007_v32 }
 0x2b5   : > { %v2010_v30 = vpop.f32.mrb[60].mxu1 }
 0x2b6   : > { %v704_v20 = vmax.f32 %v702_v48, %v2010_v30  ;;  %v2013_v63 = vpop.f32.mrb[61].mxu1 }
 0x2b7   : > { %2797 = vst [vmem:[#allocation30_spill] sm:$0xff] %v2013_v63  ;;  %v741_v28 = vmax.f32 %v739_v59, %v2013_v63  ;;  %v2016_v22 = vpop.f32.mrb[62].mxu1 }
 0x2b8   : > { %v705_v36 = vmax.f32 %v703_v4, %v2016_v22  ;;  %v2019_v16 = vpop.f32.mrb[63].mxu1 }
 0x2b9   : > { %2798 = vst [vmem:[#allocation31_spill] sm:$0xff] %v2019_v16  ;;  %v742_v40 = vmax.f32 %v740_v12, %v2019_v16 }
 0x2ba   : > { %v706_v14 = vmax.f32 %v704_v20, %v705_v36 }
 0x2bb   : > { %v743_v6 = vmax.f32 %v741_v28, %v742_v40 }
 0x2bc   : > { %v707_v61 = vrot.slane %v706_v14, 4 }
 0x2bd   : > { %v744_v44 = vrot.slane %v743_v6, 4 }
 0x2be   : > { %v708_v32 = vmax.f32 %v706_v14, %v707_v61 }
 0x2bf   : > { %v745_v49 = vmax.f32 %v743_v6, %v744_v44 }
 0x2c0   : > { %v709_v45 = vrot.slane %v708_v32, 2 }
 0x2c1   : > { %v746_v48 = vrot.slane %v745_v49, 2 }
 0x2c2   : > { %v710_v41 = vmax.f32 %v708_v32, %v709_v45 }
 0x2c3   : > { %v747_v37 = vmax.f32 %v745_v49, %v746_v48 }
 0x2c4   : > { %v711_v33 = vrot.slane %v710_v41, 1 }
 0x2c5   : > { %v748_v59 = vrot.slane %v747_v37, 1 }
 0x2c6   : > { %v2022_v63 = vmax.f32 %v710_v41, %v711_v33 }
 0x2c7   : > { %v2024_v29 = vmax.f32 %v747_v37, %v748_v59 }
 0x2c8   : > { %v750_v4 = vsub.f32 %v1830_v50, %v2022_v63  ;;  %v752_v12 = vsub.f32 %v1834_v52, %v2022_v63  ;;  %v754_v61 = vsub.f32 %v1838_v54, %v2022_v63  ;;  %v756_v6 = vsub.f32 %v1846_v58, %v2022_v63 }
 0x2c9   : > { %v758_v45 = vsub.f32 %v1854_v62, %v2022_v63  ;;  %v760_v33 = vsub.f32 %v1860_v3, %v2022_v63  ;;  %v762_v37 = vsub.f32 %v1866_v7, %v2022_v63  ;;  %v764_v50 = vsub.f32 %v1872_v11, %v2022_v63 }
 0x2ca   : > { %v766_v52 = vsub.f32 %v1878_v15, %v2022_v63  ;;  %v768_v54 = vsub.f32 %v1884_v19, %v2022_v63  ;;  %v770_v58 = vsub.f32 %v1890_v23, %v2022_v63  ;;  %v772_v62 = vsub.f32 %v1896_v27, %v2022_v63 }
 0x2cb   : > { %v774_v3 = vsub.f32 %v1902_v31, %v2022_v63  ;;  %v776_v7 = vsub.f32 %v1908_v35, %v2022_v63  ;;  %v778_v11 = vsub.f32 %v1914_v39, %v2022_v63  ;;  %v780_v15 = vsub.f32 %v1920_v43, %v2022_v63 }
 0x2cc   : > { %v782_v19 = vsub.f32 %v1926_v47, %v2022_v63  ;;  %v784_v23 = vsub.f32 %v1932_v57, %v2022_v63  ;;  %v786_v27 = vsub.f32 %v1938_v2, %v2022_v63  ;;  %v788_v31 = vsub.f32 %v1944_v10, %v2022_v63  ;;  %v2818_v47 = vld [vmem:[#allocation30_spill] sm:$0xff] }
 0x2cd   : > { %v790_v35 = vsub.f32 %v1950_v18, %v2022_v63  ;;  %v792_v39 = vsub.f32 %v1956_v26, %v2022_v63  ;;  %v794_v41 = vsub.f32 %v1962_v34, %v2022_v63  ;;  %v796_v43 = vsub.f32 %v1968_v42, %v2022_v63 }
 0x2ce   : > { %v814_v34 = vmul.f32 1.442695, %v750_v4  ;;  %v818_v42 = vmul.f32 1.442695, %v752_v12  ;;  %v822_v32 = vmul.f32 1.442695, %v754_v61 }
 0x2cf   : > { %v826_v28 = vmul.f32 1.442695, %v756_v6  ;;  %v830_v40 = vmul.f32 1.442695, %v758_v45  ;;  %v834_v44 = vmul.f32 1.442695, %v760_v33 }
 0x2d0   : > { %1426 = vpow2.f32 %v814_v34  ;;  %v838_v48 = vmul.f32 1.442695, %v762_v37  ;;  %v842_v59 = vmul.f32 1.442695, %v764_v50  ;;  %v846_v18 = vmul.f32 1.442695, %v766_v52 }
 0x2d1   : > { %1428 = vpow2.f32 %v818_v42  ;;  %v850_v26 = vmul.f32 1.442695, %v768_v54  ;;  %v854_v4 = vmul.f32 1.442695, %v770_v58  ;;  %v858_v12 = vmul.f32 1.442695, %v772_v62 }
 0x2d2   : > { %1430 = vpow2.f32 %v822_v32  ;;  %v862_v61 = vmul.f32 1.442695, %v774_v3  ;;  %v866_v20 = vmul.f32 1.442695, %v776_v7  ;;  %v870_v6 = vmul.f32 1.442695, %v778_v11 }
 0x2d3   : > { %1432 = vpow2.f32 %v826_v28  ;;  %v874_v14 = vmul.f32 1.442695, %v780_v15  ;;  %v878_v36 = vmul.f32 1.442695, %v782_v19  ;;  %v882_v34 = vmul.f32 1.442695, %v784_v23 }
 0x2d4   : > { %1434 = vpow2.f32 %v830_v40  ;;  %v886_v45 = vmul.f32 1.442695, %v786_v27  ;;  %v890_v33 = vmul.f32 1.442695, %v788_v31  ;;  %v894_v42 = vmul.f32 1.442695, %v790_v35 }
 0x2d5   : > { %1436 = vpow2.f32 %v834_v44  ;;  %v2094_v37 = vmul.f32 1.442695, %v792_v39  ;;  %v2096_v50 = vmul.f32 1.442695, %v794_v41  ;;  %v2098_v52 = vmul.f32 1.442695, %v796_v43 }
 0x2d6   : > { %1438 = vpow2.f32 %v838_v48  ;;  %v2799_v35 = vld [vmem:[#allocation11_spill] sm:$0xff]  ;;  %v2801_v32 = vld [vmem:[#allocation13_spill] sm:$0xff]  ;;  %v2802_v44 = vld [vmem:[#allocation14_spill] sm:$0xff] }
 0x2d7   : > { %1440 = vpow2.f32 %v842_v59  ;;  %v2803_v59 = vld [vmem:[#allocation15_spill] sm:$0xff]  ;;  %v2805_v31 = vld [vmem:[#allocation17_spill] sm:$0xff]  ;;  %v2806_v27 = vld [vmem:[#allocation18_spill] sm:$0xff] }
 0x2d8   : > { %1442 = vpow2.f32 %v846_v18  ;;  %v2800_v18 = vld [vmem:[#allocation12_spill] sm:$0xff]  ;;  %v2807_v48 = vld [vmem:[#allocation19_spill] sm:$0xff]  ;;  %v2809_v11 = vld [vmem:[#allocation21_spill] sm:$0xff] }
 0x2d9   : > { %1444 = vpow2.f32 %v850_v26  ;;  %v2808_v15 = vld [vmem:[#allocation20_spill] sm:$0xff]  ;;  %v2810_v28 = vld [vmem:[#allocation22_spill] sm:$0xff]  ;;  %v2811_v62 = vld [vmem:[#allocation23_spill] sm:$0xff] }
 0x2da   : > { %v2108_v7 = vpop.eup %1426  ;;  %1446 = vpow2.f32 %v854_v4  ;;  %v2812_v4 = vld [vmem:[#allocation24_spill] sm:$0xff]  ;;  %v2813_v54 = vld [vmem:[#allocation25_spill] sm:$0xff] }
 0x2db   : > { %v2116_v23 = vpop.eup %1428  ;;  %1448 = vpow2.f32 %v858_v12  ;;  %v2804_v12 = vld [vmem:[#allocation16_spill] sm:$0xff] }
 0x2dc   : > { %v2124_v41 = vpop.eup %1430  ;;  %1450 = vpow2.f32 %v862_v61  ;;  %v942_v43 = vadd.f32 %v2116_v23, %v2108_v7  ;;  %v2817_v61 = vld [vmem:[#allocation29_spill] sm:$0xff] }
 0x2dd   : > { %v2132_v40 = vpop.eup %1432  ;;  %1452 = vpow2.f32 %v866_v20  ;;  %v2815_v20 = vld [vmem:[#allocation27_spill] sm:$0xff] }
 0x2de   : > { %v2140_v39 = vpop.eup %1434  ;;  %1454 = vpow2.f32 %v870_v6  ;;  %v943_v26 = vadd.f32 %v2124_v41, %v942_v43 }
 0x2df   : > { %v2147_v19 = vpop.eup %1436  ;;  %1456 = vpow2.f32 %v874_v14 }
 0x2e0   : > { %v2155_v3 = vpop.eup %1438  ;;  %1458 = vpow2.f32 %v878_v36  ;;  %v944_v43 = vadd.f32 %v2132_v40, %v943_v26 }
 0x2e1   : > { %v2162_v58 = vpop.eup %1440  ;;  %1460 = vpow2.f32 %v882_v34 }
 0x2e2   : > { %v2170_v2 = vpop.eup %1442  ;;  %1462 = vpow2.f32 %v886_v45  ;;  %v945_v26 = vadd.f32 %v2140_v39, %v944_v43  ;;  %v2819_v43 = vsub.f32 %v1974_v55, %v2022_v63 }
 0x2e3   : > { %v2177_v49 = vpop.eup %1444  ;;  %1464 = vpow2.f32 %v890_v33  ;;  %v2820_v33 = vsub.f32 %v1980_v8, %v2022_v63 }
 0x2e4   : > { %v2185_v10 = vpop.eup %1446  ;;  %1466 = vpow2.f32 %v894_v42  ;;  %v910_v14 = vmul.f32 1.442695, %v2819_v43  ;;  %v946_v34 = vadd.f32 %v2147_v19, %v945_v26  ;;  %v2821_v42 = vsub.f32 %v1986_v24, %v2022_v63 }
 0x2e5   : > { %v2191_v57 = vpop.eup %1448  ;;  %1468 = vpow2.f32 %v2094_v37  ;;  %v914_v36 = vmul.f32 1.442695, %v2820_v33  ;;  %v2822_v37 = vsub.f32 %v1992_v0, %v2022_v63  ;;  %v2826_v0 = vsub.f32 %v2010_v30, %v2022_v63 }
 0x2e6   : > { %v2197_v6 = vpop.eup %1450  ;;  %1470 = vpow2.f32 %v2096_v50  ;;  %v918_v45 = vmul.f32 1.442695, %v2821_v42  ;;  %v947_v55 = vadd.f32 %v2155_v3, %v946_v34  ;;  %v2823_v50 = vsub.f32 %v1998_v46, %v2022_v63 }
 0x2e7   : > { %v2204_v43 = vpop.eup %1452  ;;  %1472 = vpow2.f32 %v2098_v52  ;;  %v922_v26 = vmul.f32 1.442695, %v2822_v37  ;;  %v2824_v34 = vsub.f32 %v2004_v38, %v2022_v63 }
 0x2e8   : > { %v2210_v8 = vpop.eup %1454  ;;  %1474 = vpow2.f32 %v910_v14  ;;  %v926_v33 = vmul.f32 1.442695, %v2823_v50  ;;  %v948_v24 = vadd.f32 %v2162_v58, %v947_v55  ;;  %v934_v14 = vmul.f32 1.442695, %v2826_v0 }
 0x2e9   : > { %v2216_v42 = vpop.eup %1456  ;;  %1476 = vpow2.f32 %v914_v36  ;;  %v930_v52 = vmul.f32 1.442695, %v2824_v34  ;;  %v2827_v55 = vsub.f32 %v2016_v22, %v2022_v63  ;;  %v2830_v63 = vsub.f32 %v1842_v56, %v2024_v29 }
 0x2ea   : > { %v2221_v16 = vpop.eup %1458  ;;  %1478 = vpow2.f32 %v918_v45  ;;  %v949_v37 = vadd.f32 %v2170_v2, %v948_v24  ;;  %v2828_v45 = vsub.f32 %v1832_v51, %v2024_v29  ;;  %v2829_v24 = vsub.f32 %v1836_v53, %v2024_v29 }
 0x2eb   : > { %2825 = vst [vmem:[#allocation11_spill] sm:$0xff] %v2221_v16  ;;  %v2227_v46 = vpop.eup %1460  ;;  %1480 = vpow2.f32 %v922_v26  ;;  %v938_v36 = vmul.f32 1.442695, %v2827_v55  ;;  %v2831_v51 = vsub.f32 %v1850_v60, %v2024_v29  ;;  %v2832_v53 = vsub.f32 %v1857_v1, %v2024_v29 }
 0x2ec   : > { %v2232_v50 = vpop.eup %1462  ;;  %1482 = vpow2.f32 %v926_v33  ;;  %v950_v38 = vadd.f32 %v2177_v49, %v949_v37  ;;  %v816_v34 = vmul.f32 1.442695, %v2828_v45  ;;  %v820_v26 = vmul.f32 1.442695, %v2829_v24 }
 0x2ed   : > { %v2238_v30 = vpop.eup %1464  ;;  %1484 = vpow2.f32 %v930_v52  ;;  %v824_v33 = vmul.f32 1.442695, %v2830_v63  ;;  %v828_v37 = vmul.f32 1.442695, %v2831_v51  ;;  %v832_v52 = vmul.f32 1.442695, %v2832_v53 }
 0x2ee   : > { %v2243_v0 = vpop.eup %1466  ;;  %1486 = vpow2.f32 %v934_v14  ;;  %v951_v22 = vadd.f32 %v2185_v10, %v950_v38  ;;  %v2833_v14 = vsub.f32 %v1863_v5, %v2024_v29  ;;  %v2834_v38 = vsub.f32 %v1869_v9, %v2024_v29 }
 0x2ef   : > { %v2252_v55 = vpop.eup %1468  ;;  %1488 = vpow2.f32 %v938_v36  ;;  %v2835_v36 = vsub.f32 %v1875_v13, %v2024_v29  ;;  %v2836_v1 = vsub.f32 %v1881_v17, %v2024_v29 }
 0x2f0   : > { %v836_v45 = vmul.f32 1.442695, %v2833_v14  ;;  %v840_v56 = vmul.f32 1.442695, %v2834_v38  ;;  %v2263_v24 = vpop.eup %1470  ;;  %v952_v60 = vadd.f32 %v2191_v57, %v951_v22  ;;  %1490 = vpow2.f32 %v816_v34 }
 0x2f1   : > { %v844_v63 = vmul.f32 1.442695, %v2835_v36  ;;  %v848_v51 = vmul.f32 1.442695, %v2836_v1  ;;  %v2272_v53 = vpop.eup %1472  ;;  %1492 = vpow2.f32 %v820_v26  ;;  %v2837_v36 = vsub.f32 %v1887_v21, %v2024_v29 }
 0x2f2   : > { %v2280_v22 = vpop.eup %1474  ;;  %v953_v13 = vadd.f32 %v2197_v6, %v952_v60  ;;  %1494 = vpow2.f32 %v824_v33 }
 0x2f3   : > { %v2287_v14 = vpop.eup %1476  ;;  %1496 = vpow2.f32 %v828_v37  ;;  %v852_v38 = vmul.f32 1.442695, %v2837_v36  ;;  %v2838_v37 = vsub.f32 %v1893_v25, %v2024_v29  ;;  %v2839_v36 = vsub.f32 %v2799_v35, %v2024_v29 }
 0x2f4   : > { %v2295_v60 = vpop.eup %1478  ;;  %v954_v33 = vadd.f32 %v2204_v43, %v953_v13  ;;  %1498 = vpow2.f32 %v832_v52  ;;  %v2840_v25 = vsub.f32 %v2800_v18, %v2024_v29  ;;  %v2841_v35 = vsub.f32 %v2801_v32, %v2024_v29 }
 0x2f5   : > { %v2302_v17 = vpop.eup %1480  ;;  %1500 = vpow2.f32 %v836_v45  ;;  %v856_v34 = vmul.f32 1.442695, %v2838_v37  ;;  %v860_v1 = vmul.f32 1.442695, %v2839_v36  ;;  %v2844_v32 = vsub.f32 %v2804_v12, %v2024_v29 }
 0x2f6   : > { %v2311_v52 = vpop.eup %1482  ;;  %v955_v26 = vadd.f32 %v2210_v8, %v954_v33  ;;  %1502 = vpow2.f32 %v840_v56  ;;  %v864_v33 = vmul.f32 1.442695, %v2840_v25  ;;  %v868_v36 = vmul.f32 1.442695, %v2841_v35 }
 0x2f7   : > { %v2319_v21 = vpop.eup %1484  ;;  %1504 = vpow2.f32 %v844_v63  ;;  %v880_v35 = vmul.f32 1.442695, %v2844_v32  ;;  %v2845_v18 = vsub.f32 %v2805_v31, %v2024_v29  ;;  %v2848_v31 = vsub.f32 %v2808_v15, %v2024_v29 }
 0x2f8   : > { %v2326_v9 = vpop.eup %1486  ;;  %v956_v56 = vadd.f32 %v2216_v42, %v955_v26  ;;  %1506 = vpow2.f32 %v848_v51  ;;  %v2842_v51 = vsub.f32 %v2802_v44, %v2024_v29 }
 0x2f9   : > { %v2334_v63 = vpop.eup %1488  ;;  %1508 = vpow2.f32 %v852_v38  ;;  %v2843_v38 = vsub.f32 %v2803_v59, %v2024_v29  ;;  %v2846_v59 = vsub.f32 %v2806_v27, %v2024_v29  ;;  %v2849_v27 = vpack.c.bf16 %v2116_v23, %v2108_v7 }
 0x2fa   : > { %v1491_v13 = vpop.eup %1490  ;;  %v957_v45 = vadd.f32 %v2221_v16, %v956_v56  ;;  %1510 = vpow2.f32 %v856_v34  ;;  %v872_v26 = vmul.f32 1.442695, %v2842_v51 }
 0x2fb   : > { %v1493_v25 = vpop.eup %1492  ;;  %1512 = vpow2.f32 %v860_v1  ;;  %v876_v37 = vmul.f32 1.442695, %v2843_v38  ;;  %v884_v1 = vmul.f32 1.442695, %v2845_v18  ;;  %v888_v38 = vmul.f32 1.442695, %v2846_v59 }
 0x2fc   : > { %v1495_v5 = vpop.eup %1494  ;;  %v958_v34 = vadd.f32 %v2227_v46, %v957_v45  ;;  %1514 = vpow2.f32 %v864_v33  ;;  %v979_v56 = vadd.f32 %v1493_v25, %v1491_v13  ;;  %v1038_v44 = vpack.c.bf16 %v1493_v25, %v1491_v13 }
 0x2fd   : > { %v1497_v51 = vpop.eup %1496  ;;  %1516 = vpow2.f32 %v868_v36  ;;  %v2847_v13 = vsub.f32 %v2807_v48, %v2024_v29  ;;  %v896_v18 = vmul.f32 1.442695, %v2848_v31  ;;  %v2850_v48 = vsub.f32 %v2809_v11, %v2024_v29  ;;  %v2855_v31 = vld [vmem:[#allocation26_spill] sm:$0xff] }
 0x2fe   : > { %v1499_v16 = vpop.eup %1498  ;;  %v959_v12 = vadd.f32 %v2232_v50, %v958_v34  ;;  %1518 = vpow2.f32 %v872_v26  ;;  %v980_v32 = vadd.f32 %v1495_v5, %v979_v56  ;;  %1083 = vmatprep.subr.bf16.mxu0 %v1038_v44  ;;  %v1040_v45 = vpack.c.bf16 %v1497_v51, %v1495_v5 }
 0x2ff   : > { %v1501_v33 = vpop.eup %1500  ;;  %1520 = vpow2.f32 %v876_v37  ;;  %v892_v36 = vmul.f32 1.442695, %v2847_v13  ;;  %1084 = vmatpush1.bf16.xpose.msra.mxu0 %v2849_v27  ;;  %v900_v15 = vmul.f32 1.442695, %v2850_v48  ;;  %v2851_v56 = vsub.f32 %v2810_v28, %v2024_v29 }
 0x300   : > { %v2368_v25 = vpop.eup %1502  ;;  %v960_v26 = vadd.f32 %v2238_v30, %v959_v12  ;;  %1522 = vpow2.f32 %v880_v35  ;;  %v981_v5 = vadd.f32 %v1497_v51, %v980_v32  ;;  %1085 = vmatprep.subr.bf16.mxu0 %v1040_v45  ;;  %v1042_v37 = vpack.c.bf16 %v1501_v33, %v1499_v16 }
 0x301   : > { %v2371_v34 = vpop.eup %1504  ;;  %1524 = vpow2.f32 %v884_v1  ;;  %v904_v7 = vmul.f32 1.442695, %v2851_v56  ;;  %v2852_v11 = vsub.f32 %v2811_v62, %v2024_v29  ;;  %v2853_v28 = vsub.f32 %v2812_v4, %v2024_v29  ;;  %v2858_v56 = vld [vmem:[#allocation28_spill] sm:$0xff] }
 0x302   : > { %v2379_v23 = vpop.eup %1506  ;;  %v961_v44 = vadd.f32 %v2243_v0, %v960_v26  ;;  %1526 = vpow2.f32 %v888_v38  ;;  %v982_v35 = vadd.f32 %v1499_v16, %v981_v5  ;;  %v1044_v51 = vpack.c.bf16 %v2371_v34, %v2368_v25 }
 0x303   : > { %v2384_v59 = vpop.eup %1508  ;;  %1528 = vpow2.f32 %v892_v36  ;;  %v908_v1 = vmul.f32 1.442695, %v2852_v11  ;;  %v912_v12 = vmul.f32 1.442695, %v2853_v28  ;;  %v2854_v62 = vsub.f32 %v2813_v54, %v2024_v29 }
 0x304   : > { %v2392_v32 = vpop.eup %1510  ;;  %v962_v45 = vadd.f32 %v2252_v55, %v961_v44  ;;  %1530 = vpow2.f32 %v896_v18  ;;  %v983_v16 = vadd.f32 %v1501_v33, %v982_v35  ;;  %v1046_v38 = vpack.c.bf16 %v2384_v59, %v2379_v23 }
 0x305   : > { %v2397_v13 = vpop.eup %1512  ;;  %1532 = vpow2.f32 %v900_v15  ;;  %v916_v36 = vmul.f32 1.442695, %v2854_v62  ;;  %v2856_v4 = vsub.f32 %v2855_v31, %v2024_v29  ;;  %v2857_v54 = vsub.f32 %v2815_v20, %v2024_v29 }
 0x306   : > { %v2405_v26 = vpop.eup %1514  ;;  %v963_v5 = vadd.f32 %v2263_v24, %v962_v45  ;;  %1534 = vpow2.f32 %v904_v7  ;;  %v984_v33 = vadd.f32 %v2368_v25, %v983_v16  ;;  %v1048_v18 = vpack.c.bf16 %v2397_v13, %v2392_v32 }
 0x307   : > { %v920_v27 = vmul.f32 1.442695, %v2856_v4  ;;  %v2411_v48 = vpop.eup %1516  ;;  %1536 = vpow2.f32 %v908_v1  ;;  %v924_v15 = vmul.f32 1.442695, %v2857_v54  ;;  %v2859_v44 = vsub.f32 %v2858_v56, %v2024_v29 }
 0x308   : > { %v2860_v11 = vpack.c.bf16 %v2132_v40, %v2124_v41  ;;  %v2422_v7 = vpop.eup %1518  ;;  %v964_v25 = vadd.f32 %v2272_v53, %v963_v5  ;;  %1538 = vpow2.f32 %v912_v12  ;;  %v985_v28 = vadd.f32 %v2371_v34, %v984_v33 }
 0x309   : > { %v928_v35 = vmul.f32 1.442695, %v2859_v44  ;;  %v1050_v20 = vpack.c.bf16 %v2411_v48, %v2405_v26  ;;  %v2428_v1 = vpop.eup %1520  ;;  %1540 = vpow2.f32 %v916_v36  ;;  %v2861_v45 = vsub.f32 %v2817_v61, %v2024_v29  ;;  %v2863_v36 = vld [vmem:[#allocation31_spill] sm:$0xff] }
 0x30a   : > { %1086 = vmatpush1.bf16.xpose.msra.mxu0 %v2860_v11  ;;  %v2862_v41 = vsub.f32 %v2818_v47, %v2024_v29  ;;  %v2436_v62 = vpop.eup %1522  ;;  %v965_v12 = vadd.f32 %v2280_v22, %v964_v25  ;;  %1542 = vpow2.f32 %v920_v27  ;;  %v1052_v34 = vpack.c.bf16 %v2428_v1, %v2422_v7 }
 0x30b   : > { %1087 = vmatprep.subr.bf16.mxu0 %v1042_v37  ;;  %v932_v16 = vmul.f32 1.442695, %v2861_v45  ;;  %v986_v37 = vadd.f32 %v2379_v23, %v985_v28  ;;  %v2442_v31 = vpop.eup %1524  ;;  %1544 = vpow2.f32 %v924_v15  ;;  %v2864_v61 = vsub.f32 %v2863_v36, %v2024_v29 }
 0x30c   : > { %v936_v40 = vmul.f32 1.442695, %v2862_v41  ;;  %v2447_v5 = vpop.eup %1526  ;;  %v966_v47 = vadd.f32 %v2287_v14, %v965_v12  ;;  %1546 = vpow2.f32 %v928_v35  ;;  %v1054_v27 = vpack.c.bf16 %v2442_v31, %v2436_v62 }
 0x30d   : > { %v940_v4 = vmul.f32 1.442695, %v2864_v61  ;;  %v987_v33 = vadd.f32 %v2384_v59, %v986_v37  ;;  %v2453_v54 = vpop.eup %1528  ;;  %1548 = vpow2.f32 %v932_v16  ;;  %v2865_v35 = vpack.c.bf16 %v2147_v19, %v2140_v39 }
 0x30e   : > { %v2455_v56 = vpop.eup %1530  ;;  %v967_v15 = vadd.f32 %v2295_v60, %v966_v47  ;;  %1550 = vpow2.f32 %v936_v40  ;;  %v1056_v44 = vpack.c.bf16 %v2453_v54, %v2447_v5 }
 0x30f   : > { %v988_v29 = vadd.f32 %v2392_v32, %v987_v33  ;;  %v2461_v11 = vpop.eup %1532  ;;  %1552 = vpow2.f32 %v940_v4 }
 0x310   : > { %v2466_v25 = vpop.eup %1534  ;;  %v968_v28 = vadd.f32 %v2302_v17, %v967_v15  ;;  %v1058_v16 = vpack.c.bf16 %v2461_v11, %v2455_v56 }
 0x311   : > { %v989_v45 = vadd.f32 %v2397_v13, %v988_v29  ;;  %v2472_v41 = vpop.eup %1536 }
 0x312   : > { %1088 = vmatpush1.bf16.xpose.msra.mxu0 %v2865_v35  ;;  %v2474_v40 = vpop.eup %1538  ;;  %v969_v12 = vadd.f32 %v2311_v52, %v968_v28  ;;  %v1060_v19 = vpack.c.bf16 %v2472_v41, %v2466_v25 }
 0x313   : > { %1089 = vmatprep.subr.bf16.mxu0 %v1044_v51  ;;  %v990_v37 = vadd.f32 %v2405_v26, %v989_v45  ;;  %v2480_v39 = vpop.eup %1540  ;;  %v2866_v45 = vpack.c.bf16 %v2162_v58, %v2155_v3 }
 0x314   : > { %v2482_v36 = vpop.eup %1542  ;;  %v970_v51 = vadd.f32 %v2319_v21, %v969_v12 }
 0x315   : > { %v991_v61 = vadd.f32 %v2411_v48, %v990_v37  ;;  %v2488_v47 = vpop.eup %1544 }
 0x316   : > { %v2490_v33 = vpop.eup %1546  ;;  %v971_v15 = vadd.f32 %v2326_v9, %v970_v51 }
 0x317   : > { %v992_v29 = vadd.f32 %v2422_v7, %v991_v61  ;;  %v2496_v28 = vpop.eup %1548 }
 0x318   : > { %v2501_v12 = vpop.eup %1550  ;;  %v972_v37 = vadd.f32 %v2334_v63, %v971_v15  ;;  %v1066_v51 = vpack.c.bf16 %v2496_v28, %v2490_v33 }
 0x319   : > { %v993_v4 = vadd.f32 %v2428_v1, %v992_v29  ;;  %v2510_v61 = vpop.eup %1552  ;;  %v2867_v29 = vpack.c.bf16 %v2177_v49, %v2170_v2 }
 0x31a   : > { %1090 = vmatpush1.bf16.xpose.msra.mxu0 %v2866_v45  ;;  %v1068_v58 = vpack.c.bf16 %v2510_v61, %v2501_v12  ;;  %v973_v2 = vrot.slane %v972_v37, 4 }
 0x31b   : > { %1091 = vmatprep.subr.bf16.mxu0 %v1046_v38  ;;  %v994_v35 = vadd.f32 %v2436_v62, %v993_v4  ;;  %v2873_v62 = vpack.c.bf16 %v2238_v30, %v2232_v50 }
 0x31d   : > { %v995_v3 = vadd.f32 %v2442_v31, %v994_v35  ;;  %v2868_v35 = vpack.c.bf16 %v2191_v57, %v2185_v10  ;;  %v376_v31 = vlaneseq }
 0x31f   : > { %v996_v15 = vadd.f32 %v2447_v5, %v995_v3  ;;  %v974_v3 = vadd.f32 %v973_v2, %v972_v37  ;;  %vm2608_vm3 = vcmp.lt.s32.totalorder %v376_v31, 256 }
 0x321   : > { %v997_v23 = vadd.f32 %v2453_v54, %v996_v15  ;;  %v975_v26 = vrot.slane %v974_v3, 2  ;;  %v2870_v15 = vpack.c.bf16 %v2216_v42, %v2210_v8  ;;  %v2874_v54 = vpack.c.bf16 %v2252_v55, %v2243_v0 }
 0x322   : > { %1092 = vmatpush1.bf16.xpose.msra.mxu0 %v2867_v29  ;;  %v2871_v29 = vld [vmem:[#allocation11_spill] sm:$0xff]  ;;  %v2876_v0 = vpack.c.bf16 %v2480_v39, %v2474_v40 }
 0x323   : > { %1093 = vmatprep.subr.bf16.mxu0 %v1048_v18  ;;  %v998_v59 = vadd.f32 %v2455_v56, %v997_v23  ;;  %v2869_v18 = vpack.c.bf16 %v2204_v43, %v2197_v6  ;;  %v976_v6 = vadd.f32 %v975_v26, %v974_v3  ;;  %v2872_v23 = vpack.c.bf16 %v2227_v46, %v2871_v29  ;;  %v1159_v3 = vld [vmem:[%s1779_s16 + $0x18] sm:$0xff] }
 0x325   : > { %v999_v38 = vadd.f32 %v2461_v11, %v998_v59  ;;  %v977_v1 = vrot.slane %v976_v6, 1  ;;  %v390_v11 = vld [vmem:[#allocation2] ss:$8 sm:$0x3] }
 0x327   : > { %v1000_v4 = vadd.f32 %v2466_v25, %v999_v38  ;;  %v978_v59 = vadd.f32 %v977_v1, %v976_v6 }
 0x329   : > { %v1001_v45 = vadd.f32 %v2472_v41, %v1000_v4  ;;  %1554 = vrcp.f32 %v978_v59  ;;  %v2877_v41 = vpack.c.bf16 %v2287_v14, %v2280_v22  ;;  %v2881_v14 = vpack.c.bf16 %v2334_v63, %v2326_v9 }
 0x32a   : > { %1094 = vmatpush1.bf16.xpose.msra.mxu0 %v2868_v35  ;;  %v2566_v35 = vshrl.u32 %v376_v31, 7 }
 0x32b   : > { %1095 = vmatprep.subr.bf16.mxu0 %v1050_v20  ;;  %v1002_v49 = vadd.f32 %v2474_v40, %v1001_v45 }
 0x32c   : > { %v1076_v56 = vsub.s32 1, %v2566_v35  ;;  %v1072_v22 = vsub.s32 0, %v2566_v35 }
 0x32d   : > { %v1003_v32 = vadd.f32 %v2480_v39, %v1002_v49 }
 0x32f   : > { %v1004_v13 = vadd.f32 %v2482_v36, %v1003_v32  ;;  %v1156_v32 = vld [vmem:[%s1779_s16] sm:$0xff] }
 0x331   : > { %v1005_v57 = vadd.f32 %v2488_v47, %v1004_v13  ;;  %v1157_v13 = vld [vmem:[%s1779_s16 + $0x8] sm:$0xff] }
 0x332   : > { %1096 = vmatpush1.bf16.xpose.msra.mxu0 %v2869_v18  ;;  %v1158_v18 = vld [vmem:[%s1779_s16 + $0x10] sm:$0xff] }
 0x333   : > { %1097 = vmatprep.subr.bf16.mxu0 %v1052_v34  ;;  %v1006_v10 = vadd.f32 %v2490_v33, %v1005_v57  ;;  %v1555_v5 = vpop.eup %1554 }
 0x335   : > { %v1007_v48 = vadd.f32 %v2496_v28, %v1006_v10 }
 0x337   : > { %v1008_v20 = vadd.f32 %v2501_v12, %v1007_v48 }
 0x339   : > { %v1009_v43 = vadd.f32 %v2510_v61, %v1008_v20 }
 0x33a   : > { %1098 = vmatpush1.bf16.xpose.msra.mxu0 %v2870_v15 }
 0x33b   : > { %1099 = vmatprep.subr.bf16.mxu0 %v1054_v27  ;;  %v1010_v7 = vrot.slane %v1009_v43, 4  ;;  %v1672_v27 = vmov 1966171168  }
 0x33c   : > { %v1022_v4 = vunpack.c.l.s4 %v1672_v27 }
 0x33d   : > { %v1011_v34 = vadd.f32 %v1010_v7, %v1009_v43 }
 0x33e   : > { %v1023_v46 = vunpack.c.0.s8 %v1022_v4 }
 0x33f   : > { %v1012_v37 = vrot.slane %v1011_v34, 2 }
 0x341   : > { %v1013_v38 = vadd.f32 %v1012_v37, %v1011_v34 }
 0x342   : > { %1100 = vmatpush1.bf16.xpose.msra.mxu0 %v2872_v23 }
 0x343   : > { %1101 = vmatprep.subr.bf16.mxu0 %v1056_v44  ;;  %v1014_v8 = vrot.slane %v1013_v38, 1  ;;  %v1026_v44 = vsub.s32 %v1023_v46, %v2566_v35 }
 0x345   : > { %v1015_v42 = vadd.f32 %v1014_v8, %v1013_v38 }
 0x347   : > { %1556 = vrcp.f32 %v1015_v42 }
 0x34a   : > { %1102 = vmatpush1.bf16.xpose.msra.mxu0 %v2873_v62 }
 0x34b   : > { %1103 = vmatprep.subr.bf16.mxu0 %v1058_v16  ;;  %v2875_v16 = vpack.c.bf16 %v2272_v53, %v2263_v24  ;;  %v2879_v24 = vpack.c.bf16 %v2302_v17, %v2295_v60  ;;  %v2880_v53 = vpack.c.bf16 %v2319_v21, %v2311_v52  ;;  %v2884_v52 = vmov 0.0  }
 0x34c   : > { %380 = vst.msk [vmem:[#allocation3] sm:$0x3] %vm2608_vm3, %v2884_v52 }
 0x351   : > { %v1557_v45 = vpop.eup %1556 }
 0x352   : > { %1104 = vmatpush1.bf16.xpose.msra.mxu0 %v2874_v54  ;;  %v1020_v50 = vcombine.low %v1555_v5, %v1557_v45 }
 0x353   : > { %1105 = vmatprep.subr.bf16.mxu0 %v1060_v19  ;;  %v2878_v19 = vpack.c.bf16 %v2488_v47, %v2482_v36  ;;  %v1082_v33 = vld [vmem:[#allocation3] sm:$0x3] }
 0x354   : > { %v1027_v30 = vrot.slane %v1020_v50, %v1026_v44 }
 0x356   : > { %v1034_v49 = vrot.slane %v1027_v30, %v1026_v44 }
 0x358   : > { %v1036_v2 = vmul.f32 %v1034_v49, %v390_v11 }
 0x35a   : > { %1106 = vmatpush1.bf16.xpose.msra.mxu0 %v2875_v16  ;;  %v1077_v55 = vrot.slane %v1036_v2, %v1076_v56  ;;  %v1073_v17 = vrot.slane %v1036_v2, %v1072_v22 }
 0x35b   : > { %1107 = vmatprep.subr.bf16.mxu0 %v2876_v0 }
 0x35c   : > { %v1081_v25 = vpack.c.bf16 %v1077_v55, %v1077_v55  ;;  %v1080_v60 = vpack.c.bf16 %v1073_v17, %v1073_v17 }
 0x35e   : > { %1115 = vmatprep.mubr.bf16.mxu0 %v1081_v25 }
 0x362   : > { %1108 = vmatpush1.bf16.xpose.msra.mxu0 %v2877_v41 }
 0x363   : > { %1109 = vmatprep.subr.bf16.mxu0 %v2878_v19 }
 0x36a   : > { %1110 = vmatpush1.bf16.xpose.msra.mxu0 %v2879_v24 }
 0x36b   : > { %1111 = vmatprep.subr.bf16.mxu0 %v1066_v51  ;;  %v1154_v51 = vstv %s1153_s10  ;;  %s1673_s10 = smov [#allocation5]  }
 0x36c   : > { %s1562_s11 = sshll.u32 %s1673_s10, 4  ;;  %s1563_s11 = int_to_ptr.vmem [resolvable:$false] %s1562_s11 }
 0x36d   : > { %s1564_s13 = scalar_lea.vmem %s1563_s11, 64  ;;  %p1565_p1 = scmp.lt.s32.totalorder %s2628_s15, %s1563_s11 }
 0x36e   : > { %p1566_p2 = scmp.lt.s32.totalorder %s1564_s13, %s1558_s8 }
 0x370   : > { %p1567_p3 = por %p1566_p2, %p1565_p1 }
 0x372   : > { %1112 = vmatpush1.bf16.xpose.msra.mxu0 %v2880_v53  ;;  %p1568_p5 = pnand %p1567_p3, %p1561_p0 }
 0x373   : > { %1113 = vmatprep.subr.bf16.mxu0 %v1068_v58 }
 0x37a   : > { %1114 = vmatpush1.bf16.xpose.msra.mxu0 %v2881_v14 }
 0x381   : > { %1116 = vmatmul.mubr.bf16.vlgmr.msra.gmra.mrb[8].mxu0 %v1080_v60 }
 0x454   : > { %v1117_v21 = vpop.f32.mrb[8].mxu0 }
 0x455   : > { %v1119_v39 = vpop.f32.mrb[9].mxu0 }
 0x456   : > { %v1126_v36 = vcombine.low %v1117_v21, %v1119_v39  ;;  %v1121_v47 = vpop.f32.mrb[10].mxu0 }
 0x457   : > { %v1122_v9 = vpop.f32.mrb[11].mxu0 }
 0x458   : > { %v1133_v63 = vrot.slane %v1126_v36, %v1026_v44 }
 0x45a   : > { %v1140_v28 = vrot.slane %v1133_v63, %v1026_v44 }
 0x45c   : > { %v1142_v12 = vadd.f32 %v1140_v28, %v1082_v33 }
 0x45e   : > { %1147 = vst.msk [vmem:[#allocation3] sm:$0x3] %vm2608_vm3, %v1142_v12 }
 0x465   : > { %v1151_v61 = vld [vmem:[#allocation3] sm:$0x3] }
 0x466   : > { %1152 = vst.msk [vmem:[%s234_s14] sm:$0x3] %vm2608_vm3, %v1151_v61  ;;  %v1155_v58 = vmul.f32 %v1154_v51, %v1151_v61 }
 0x467   : > { %1571 = shalt.err (!%p1568_p5)
}
 0x468   : > { %s1572_s16 = scalar_lea.hbm %s2626_s19, 32  ;;  %s1576_s17 = scalar_lea.hbm %s2731_s4, 64 }
 0x469   : > { %p1573_p6 = scmp.ne.s32.totalorder %s2626_s19, %s1572_s16  ;;  %p1577_p10 = scmp.lt.u32.totalorder %s2626_s19, %s2731_s4 }
 0x46a   : > { %p1578_p11 = scmp.lt.u32.totalorder %s1576_s17, %s1572_s16  ;;  %p1580_p13 = scmp.lt.u32.totalorder %s1572_s16, %s2626_s19 }
 0x46b   : > { %p1574_p7 = pnand %p1573_p6, %p1750_p4 }
 0x46c   : > { %p1579_p12 = por %p1578_p11, %p1577_p10 }
 0x46d   : > { %p1575_p9 = pneg %p1574_p7 }
 0x46e   : > { %p1581_p0 = por %p1580_p13, %p1579_p12 }
 0x470   : > { %p1582_p1 = pnand %p1581_p0, %p1575_p9 }
 0x472   : > { %1585 = shalt.err (!%p1582_p1)
}
 0x473   : > { %1360 = dma.vmem_to_hbm [thread:$0]  (%p1750_p4), %s2628_s15, 32, %s2626_s19, %s1180_s30   ;;  %v1164_v57 = vrot.slane %v1155_v58, %v1072_v22  ;;  %v1168_v10 = vrot.slane %v1155_v58, %v1076_v56 }
 0x474   : > { %s2675_s13 = scalar_lea.hbm %s2732_s5, %s1355_s28  ;;  %s1185_s15 = scalar_lea.sflag [#allocation8], %s2616_s9 }
 0x475   : > { %v1171_v26 = vadd.f32 %v1164_v57, %v1156_v32  ;;  %v1172_v48 = vadd.f32 %v1168_v10, %v1157_v13  ;;  %v1173_v20 = vadd.f32 %v1164_v57, %v1158_v18  ;;  %v1174_v15 = vadd.f32 %v1168_v10, %v1159_v3  ;;  %s1586_s19 = scalar_lea.vmem %s2668_s26, 512  ;;  %s1674_s23 = smov [#allocation7]  }
 0x476   : > { %p1587_p2 = scmp.ne.s32.totalorder %s2668_s26, %s1586_s19  ;;  %s1590_s30 = sshll.u32 %s1674_s23, 4  ;;  %s1591_s30 = int_to_ptr.vmem [resolvable:$false] %s1590_s30 }
 0x477   : > { %1175 = vst [vmem:[%s2633_s3] sm:$0xff] %v1171_v26  ;;  %1176 = vst [vmem:[%s2633_s3 + $0x8] sm:$0xff] %v1172_v48  ;;  %s1592_s28 = scalar_lea.vmem %s1591_s30, 1024  ;;  %p1593_p6 = scmp.lt.s32.totalorder %s2668_s26, %s1591_s30 }
 0x478   : > { %1177 = vst [vmem:[%s2633_s3 + $0x10] sm:$0xff] %v1173_v20  ;;  %1178 = vst [vmem:[%s2633_s3 + $0x18] sm:$0xff] %v1174_v15  ;;  %p1588_p3 = pnand %p1587_p2, %p1750_p4  ;;  %p1594_p7 = scmp.lt.s32.totalorder %s1592_s28, %s1586_s19 }
 0x47a   : > { %p1589_p5 = pneg %p1588_p3  ;;  %p1595_p9 = por %p1594_p7, %p1593_p6 }
 0x47c   : > { %p1596_p10 = pnand %p1595_p9, %p1589_p5 }
 0x47e   : > { %1599 = shalt.err (!%p1596_p10)
}
 0x47f   : > { %s1600_s3 = scalar_lea.hbm %s2675_s13, 512  ;;  %s1604_s14 = scalar_lea.hbm %s2732_s5, 1024 }
 0x480   : > { %p1601_p11 = scmp.ne.s32.totalorder %s2675_s13, %s1600_s3  ;;  %p1605_p0 = scmp.lt.u32.totalorder %s2675_s13, %s2732_s5 }
 0x481   : > { %p1606_p1 = scmp.lt.u32.totalorder %s1604_s14, %s1600_s3  ;;  %p1608_p3 = scmp.lt.u32.totalorder %s1600_s3, %s2675_s13 }
 0x482   : > { %p1602_p12 = pnand %p1601_p11, %p1750_p4 }
 0x483   : > { %p1607_p2 = por %p1606_p1, %p1605_p0 }
 0x484   : > { %p1603_p13 = pneg %p1602_p12 }
 0x485   : > { %p1609_p5 = por %p1608_p3, %p1607_p2 }
 0x487   : > { %p1610_p6 = pnand %p1609_p5, %p1603_p13 }
 0x489   : > { %1613 = shalt.err (!%p1610_p6)
}
 0x48a   : > { %s1675_s10 = smov 256   ;;  %s1676_s8 = smov 16  }
 0x48b   : > { %1361 = dma.vmem_to_hbm [thread:$0]  (%p1750_p4), %s2668_s26, 512, %s2675_s13, %s1185_s15, %s1675_s10, %s1675_s10, %s1676_s8  }
 0x48c PF: > { %p1371_p7 = scmp.ge.s32.totalorder %s1668_s25, 2  ;;  %s1227_s11 = sand.u32 1, %s1648_s20  }
 0x48d   : > { %s1228_s19 = scalar_lea.sflag [#allocation6], %s1227_s11 }
 0x48e   : > { %p1365_p9 = pnand %p1371_p7, %p1757_p8 }
 0x490   : > { %1639 = dma.done.wait (!%p1365_p9), %s1228_s19, 32  }
 0x491   : > { %1641 = vsyncadd (!%p1365_p9), %s1228_s19, 4294967264  ;;  %s1237_s23 = scalar_lea.sflag [#allocation8], %s1227_s11 }
 0x492   : > { %1643 = dma.done.wait (!%p1365_p9), %s1237_s23, 512  }
 0x493   : > { %1645 = vsyncadd (!%p1365_p9), %s1237_s23, 4294966784  ;;  %s23_s25 = sadd.s32 1, %s1668_s25   ;;  %s2885_s20 = smov %s1652_s21 }
 0x494   : > { %p20_p10 = scmp.ge.s32.totalorder %s23_s25, 4   ;;  %s2886_s21 = smov %s1656_s22 }
 0x495   : > { %s2887_s22 = smov %s1763_s7  ;;  %s2888_s23 = smov %s1664_s24 }
 0x496   : > { %s2889_s24 = smov %s2891_s27  ;;  %22 = sbr.rel (!%p20_p10) target bundleno = 8 (0x8), region = 97 }
 0x49d   :  { %1242 = vsyncpa [#allocation6], 1 }
 0x49e   :  { %1244 = vsyncpa [#allocation6 + $0x1], 1 }
 0x49f   :  { %1245 = vsyncpa [#allocation8], 1 }
 0x4a0   :  { %1247 = vsyncpa [#allocation8 + $0x1], 1 }

</bundles_post_ra>
